<compile_context>
chip_gen: v7x
topology: tpu7x:2x2x1
jax: 0.10.0
libtpu: 0.0.40
codegen_flags: <defaults>
</compile_context>

<pallas_src>
import functools
import math

import jax
import jax.numpy as jnp
from jax import lax
from jax.experimental import pallas as pl
from jax.experimental.pallas import tpu as pltpu


# ----------------------------------------------------------------------------
# Generation-aware VMEM sizing
# ----------------------------------------------------------------------------
def _vmem_capacity_bytes():
    """Physical per-core VMEM (128 MiB v5e/v6e, 64 MiB v7x); conservative fallback."""
    fn = getattr(pltpu, "get_tpu_info", None)
    if fn is not None:
        try:
            cap = int(fn().vmem_capacity_bytes)
            if cap > 0:
                return cap
        except Exception:
            pass
    return 64 * 1024 * 1024  # assume the smallest generation (v7x) when unknown


def _vmem_limit_bytes():
    cap = _vmem_capacity_bytes()
    # Leave headroom for Mosaic-internal scratch: ~48 MiB on v7x, ~96 MiB on v5e/v6e.
    return max(16 * 1024 * 1024, min(cap - 16 * 1024 * 1024, int(cap * 0.75)))


def _divisor_candidates(dim, cands):
    out = [c for c in cands if c <= dim and dim % c == 0]
    if dim not in out:
        out.append(dim)  # the full dim is always a legal block
    return out


# ----------------------------------------------------------------------------
# Pallas kernel 1: tiled, pipelined linear projection  out = x @ w + b
# ----------------------------------------------------------------------------
def _matmul_bias_kernel(x_ref, w_ref, b_ref, o_ref, acc_ref):
    @pl.when(pl.program_id(2) == 0)
    def _init():
        acc_ref[...] = jnp.zeros_like(acc_ref)

    acc_ref[...] += jnp.dot(x_ref[...], w_ref[...],
                            preferred_element_type=jnp.float32)

    @pl.when(pl.program_id(2) == pl.num_programs(2) - 1)
    def _finalize():
        o_ref[...] = (acc_ref[...] + b_ref[...].astype(jnp.float32)
                      ).astype(o_ref.dtype)


def _linear_tiles(M, N, K, in_isz, out_isz, budget):
    tms = _divisor_candidates(M, (512, 256, 128, 64, 32, 16, 8))
    tns = _divisor_candidates(N, (512, 256, 128))
    tks = _divisor_candidates(K, (1024, 512, 256, 128))

    def footprint(tm, tn, tk):
        return (2 * (tm * tk + tk * tn + tn) * in_isz   # double-buffered A, B, bias
                + 2 * tm * tn * out_isz                  # double-buffered output tile
                + tm * tn * 4)                           # f32 accumulator scratch

    best, best_key = None, None
    for tm in tms:
        for tn in tns:
            for tk in tks:
                if footprint(tm, tn, tk) > budget:
                    continue
                # Prefer big, balanced output tiles (fewer A/B re-streams), then deep K.
                key = (min(tm, tn), tm * tn, tk)
                if best is None or key > best_key:
                    best, best_key = (tm, tn, tk), key
    if best is None:  # degenerate shapes: smallest legal tiles
        best = (min(tms), min(tns), min(tks))
    return best


def linear_pallas(x2d, w, b):
    """x2d: (M, K), w: (K, N) (pre-transposed vs. torch), b: (N,)."""
    M, K = x2d.shape
    N = w.shape[1]
    isz = x2d.dtype.itemsize
    limit = _vmem_limit_bytes()
    tm, tn, tk = _linear_tiles(M, N, K, isz, isz, budget=int(limit * 0.55))
    b2 = b.reshape(1, N)
    cost = pl.CostEstimate(
        flops=2 * M * N * K,
        transcendentals=0,
        bytes_accessed=(M * K + K * N + N + M * N) * isz)
    return pl.pallas_call(
        _matmul_bias_kernel,
        out_shape=jax.ShapeDtypeStruct((M, N), x2d.dtype),
        grid=(M // tm, N // tn, K // tk),
        in_specs=[
            pl.BlockSpec((tm, tk), lambda i, j, k: (i, k)),
            pl.BlockSpec((tk, tn), lambda i, j, k: (k, j)),
            pl.BlockSpec((1, tn), lambda i, j, k: (0, j)),
        ],
        out_specs=pl.BlockSpec((tm, tn), lambda i, j, k: (i, j)),
        scratch_shapes=[pltpu.VMEM((tm, tn), jnp.float32)],
        compiler_params=pltpu.CompilerParams(
            dimension_semantics=("parallel", "parallel", "arbitrary"),
            vmem_limit_bytes=limit),
        cost_estimate=cost,
    )(x2d, w, b2)


# ----------------------------------------------------------------------------
# Pallas kernel 2: fused dilated gather + segment attention + scatter-back
#   y block  : (T, P, r*3H)   -- T segments, rows = in-segment point index p,
#                                columns = (residue c, [k | v | q], head, head_dim)
#   out block: (T, P, r*H)    -- columns = (residue c, head, head_dim), lane-dense
# ----------------------------------------------------------------------------
def _dilated_attn_kernel(y_ref, o_ref, *, nh, hd, r, scale, causal, mxu_dtype):
    T, P, _ = y_ref.shape
    H = nh * hd
    C3 = 3 * H
    y = y_ref[...]                                    # one pass over the block

    # In-VMEM dilated gather: residue slab c holds positions p*r + c.
    used = sorted({h % r for h in range(nh)})
    slab = {c: y[:, :, c * C3:(c + 1) * C3] for c in used}     # each (T, P, 3H)

    qs, ks, vs = [], [], []
    for h in range(nh):
        ys = slab[h % r]
        ks.append(ys[:, :, h * hd:(h + 1) * hd])
        vs.append(ys[:, :, H + h * hd:H + (h + 1) * hd])
        qs.append(ys[:, :, 2 * H + h * hd:2 * H + (h + 1) * hd])
    q = jnp.stack(qs, axis=1).reshape(T * nh, P, hd).astype(mxu_dtype)
    k = jnp.stack(ks, axis=1).reshape(T * nh, P, hd).astype(mxu_dtype)
    v = jnp.stack(vs, axis=1).reshape(T * nh, P, hd).astype(mxu_dtype)

    # Segment-local softmax attention; MXU matmuls accumulate in f32.
    s = jnp.einsum("bpd,bqd->bpq", q, k,
                   preferred_element_type=jnp.float32) * scale
    if causal:
        row = lax.broadcasted_iota(jnp.int32, (P, P), 0)
        col = lax.broadcasted_iota(jnp.int32, (P, P), 1)
        s = jnp.where((col <= row)[None, :, :], s, -jnp.inf)
    m = jnp.max(s, axis=-1, keepdims=True)
    p = jnp.exp(s - m)
    l = jnp.sum(p, axis=-1, keepdims=True)
    inv = pl.reciprocal(l, approx=True)               # EUP slot, essentially free
    inv = inv * (2.0 - l * inv)                       # one Newton step -> ~f32 accuracy
    p = p * inv

    ctx = jnp.einsum("bpq,bqd->bpd", p.astype(mxu_dtype), v,
                     preferred_element_type=jnp.float32)       # (T*nh, P, hd)
    ctx = ctx.reshape(T, nh, P, hd)

    # In-VMEM scatter-back: position p*r + c keeps head h's context iff h % r == c,
    # every other (position, head) slot stays zero (matches torch.scatter on zeros).
    zero = jnp.zeros((T, P, hd), dtype=o_ref.dtype)
    chunks = []
    for c in range(r):
        for h in range(nh):
            chunks.append(ctx[:, h].astype(o_ref.dtype) if h % r == c else zero)
    o_ref[...] = jnp.concatenate(chunks, axis=-1)     # (T, P, r*H), lane-dense store


def _attn_segments_per_step(bs_seg, P, r, H, nh, hd, in_isz, out_isz, mxu_isz,
                            budget):
    """Largest divisor of bs_seg whose full working set fits the VMEM budget."""
    c3 = 3 * H
    per_t = (2 * P * r * c3 * in_isz            # double-buffered input block
             + 2 * P * r * H * out_isz          # double-buffered output block
             + 3 * nh * P * hd * (4 + mxu_isz)  # q/k/v f32 slabs + MXU-dtype copies
             + 2 * nh * P * P * 4               # s and p logits in f32
             + nh * P * hd * 4                  # f32 context
             + P * r * H * 4)                   # output assembly before the store
    per_t = max(1, int(per_t * 1.25))           # layout / fragmentation fudge
    cap = max(1, min(bs_seg, budget // per_t))
    for t in range(cap, 0, -1):
        if bs_seg % t == 0:
            return t
    return 1


def dilated_attention_pallas(y, B, num_seg, P, r, nh, hd, *, scale, causal,
                             mxu_dtype, out_dtype):
    H = nh * hd
    bs_seg = B * num_seg
    # Free, row-major reshape: row index (b, seg, p), column index (c, [k|v|q], h, d).
    y3 = y.reshape(bs_seg, P, r * 3 * H)
    limit = _vmem_limit_bytes()
    T = _attn_segments_per_step(
        bs_seg, P, r, H, nh, hd, y.dtype.itemsize, jnp.dtype(out_dtype).itemsize,
        jnp.dtype(mxu_dtype).itemsize, budget=int(limit * 0.55))
    cost = pl.CostEstimate(
        flops=4 * bs_seg * nh * P * P * hd,
        transcendentals=bs_seg * nh * P * P,
        bytes_accessed=bs_seg * P * r * (3 * H * y.dtype.itemsize
                                         + H * jnp.dtype(out_dtype).itemsize))
    out3 = pl.pallas_call(
        functools.partial(_dilated_attn_kernel, nh=nh, hd=hd, r=r, scale=scale,
                          causal=causal, mxu_dtype=mxu_dtype),
        out_shape=jax.ShapeDtypeStruct((bs_seg, P, r * H), out_dtype),
        grid=(bs_seg // T,),
        in_specs=[pl.BlockSpec((T, P, r * 3 * H), lambda i: (i, 0, 0))],
        out_specs=pl.BlockSpec((T, P, r * H), lambda i: (i, 0, 0)),
        compiler_params=pltpu.CompilerParams(
            dimension_semantics=("parallel",),
            vmem_limit_bytes=limit),
        cost_estimate=cost,
    )(y3)
    # Free reshape back to (B, S, H): (b, seg, p, c, col) is already row-major order.
    return out3.reshape(B, num_seg * P * r, H)


# ----------------------------------------------------------------------------
# Full forward pass
# ----------------------------------------------------------------------------
def dilated_attention_forward(X, params, *, w, r, num_heads, scale=None,
                              causal=False, use_bf16_matmul=True):
    B, S, H = X.shape
    assert S % w == 0, "sequence length must be divisible by the segment length"
    assert H % num_heads == 0
    assert w % r == 0
    nh = num_heads
    hd = H // nh
    num_seg = S // w
    P = w // r
    if scale is None:
        scale = 1.0 / math.sqrt(hd)
    mxu_dtype = jnp.bfloat16 if use_bf16_matmul else jnp.float32

    # Fused [kv | q] projection: one tiled, pipelined matmul; X read from HBM once.
    w3 = jnp.concatenate([params["kv_w"], params["q_w"]], axis=1)   # (H, 3H)
    b3 = jnp.concatenate([params["kv_b"], params["q_b"]], axis=0)   # (3H,)
    y = linear_pallas(X.reshape(B * S, H), w3, b3)                  # (B*S, 3H)

    # Fused dilated-gather + segment attention + scatter-back: activations make
    # exactly one HBM round-trip after the projection.
    out = dilated_attention_pallas(y, B, num_seg, P, r, nh, hd, scale=scale,
                                   causal=causal, mxu_dtype=mxu_dtype,
                                   out_dtype=X.dtype)
    # TODO(synk): dropout (dropout_p > 0) and normalize_with_softmax (needs flash_attn's
    # returned attn_probs buffer) are not implemented.
    # TODO(synk): for very large P (= w/r >= ~512), switch the in-kernel softmax to a
    # flash-style online loop over KV blocks instead of materializing (P, P) logits.
    return out


# ----------------------------------------------------------------------------
# Pure-JAX reference (dense, no Pallas) for the correctness check
# ----------------------------------------------------------------------------
def reference_forward(X, params, *, w, r, num_heads, scale=None, causal=False):
    B, S, H = X.shape
    nh = num_heads
    hd = H // nh
    num_seg = S // w
    P = w // r
    if scale is None:
        scale = 1.0 / math.sqrt(hd)
    kv = (X.reshape(B * S, H) @ params["kv_w"] + params["kv_b"]).reshape(B, S, 2, nh, hd)
    q = (X.reshape(B * S, H) @ params["q_w"] + params["q_b"]).reshape(B, S, nh, hd)
    out = jnp.zeros((B, S, nh, hd), dtype=jnp.float32)
    for h in range(nh):
        qh = q[:, h % r::r, h, :].reshape(B, num_seg, P, hd)
        kh = kv[:, h % r::r, 0, h, :].reshape(B, num_seg, P, hd)
        vh = kv[:, h % r::r, 1, h, :].reshape(B, num_seg, P, hd)
        s = jnp.einsum("bspd,bsqd->bspq", qh, kh) * scale
        if causal:
            msk = jnp.tril(jnp.ones((P, P), bool))
            s = jnp.where(msk, s, -jnp.inf)
        p = jax.nn.softmax(s, axis=-1)
        ctx = jnp.einsum("bspq,bsqd->bspd", p, vh).reshape(B, num_seg * P, hd)
        out = out.at[:, h % r::r, h, :].set(ctx)
    return out.reshape(B, S, H)


# ----------------------------------------------------------------------------
if __name__ == "__main__":
    # Small config consistent with the module's constraints.
    batch, seq, hidden = 2, 16, 32
    num_heads = 4
    segment_length, dilation = 8, 2          # num_points = 4, num_segments = 2

    key = jax.random.PRNGKey(0)
    kx, k1, k2, k3, k4 = jax.random.split(key, 5)
    X = jax.random.normal(kx, (batch, seq, hidden), dtype=jnp.float32)

    # Deterministic parameters (shapes from nn.Linear), stored pre-transposed: (in, out).
    params = {
        "kv_w": jax.random.normal(k1, (hidden, 2 * hidden), dtype=jnp.float32) * 0.05,
        "kv_b": jax.random.normal(k2, (2 * hidden,), dtype=jnp.float32) * 0.05,
        "q_w": jax.random.normal(k3, (hidden, hidden), dtype=jnp.float32) * 0.05,
        "q_b": jax.random.normal(k4, (hidden,), dtype=jnp.float32) * 0.05,
    }

    ref = reference_forward(X, params, w=segment_length, r=dilation,
                            num_heads=num_heads)
    ref_causal = reference_forward(X, params, w=segment_length, r=dilation,
                                   num_heads=num_heads, causal=True)

    base = functools.partial(dilated_attention_forward, w=segment_length,
                             r=dilation, num_heads=num_heads)

    # 1) Exact (f32 MXU) path, non-causal.
    out_f32 = jax.block_until_ready(
        jax.jit(functools.partial(base, use_bf16_matmul=False))(X, params))
    assert out_f32.shape == (batch, seq, hidden)
    assert jnp.allclose(out_f32, ref, atol=1e-3, rtol=1e-3), "f32 mismatch vs reference"

    # 2) Exact (f32 MXU) path, causal mask.
    out_causal = jax.block_until_ready(
        jax.jit(functools.partial(base, use_bf16_matmul=False, causal=True))(X, params))
    assert jnp.allclose(out_causal, ref_causal, atol=1e-3, rtol=1e-3), \
        "causal mismatch vs reference"

    # 3) Default fast path: bf16 MXU operands, f32 accumulation/softmax.
    out_bf16 = jax.block_until_ready(jax.jit(base)(X, params))
    assert jnp.allclose(out_bf16, ref, atol=3e-2, rtol=3e-2), \
        "bf16-MXU mismatch vs reference"

    print("KERNEL_OK")
</pallas_src>

<mosaic_0001>
module attributes {stable_mosaic.version = 11 : i64} {
  func.func @_matmul_bias_kernel(%arg0: i32, %arg1: i32, %arg2: i32, %arg3: memref<32x32xf32, #tpu.memory_space<vmem>>, %arg4: memref<32x96xf32, #tpu.memory_space<vmem>>, %arg5: memref<1x96xf32, #tpu.memory_space<vmem>>, %arg6: memref<32x96xf32, #tpu.memory_space<vmem>>, %arg7: memref<32x96xf32, #tpu.memory_space<vmem>>) attributes {dimension_semantics = [#tpu.dimension_semantics<parallel>, #tpu.dimension_semantics<parallel>, #tpu.dimension_semantics<arbitrary>], iteration_bounds = array<i64: 1, 1, 1>, scalar_prefetch = 0 : i64, scratch_operands = 1 : i64, tpu.core_type = #tpu.core_type<tc>, window_params = [{transform_indices = @transform_0, window_bounds = array<i64: 32, 32>}, {transform_indices = @transform_1, window_bounds = array<i64: 32, 96>}, {transform_indices = @transform_2, window_bounds = array<i64: 1, 96>}, {transform_indices = @transform_3, window_bounds = array<i64: 32, 96>}]} {
    %c0_i32 = arith.constant 0 : i32
    %0 = arith.cmpi eq, %arg2, %c0_i32 : i32
    %1 = arith.extui %0 : i1 to i32
    %c0_i32_0 = arith.constant 0 : i32
    %2 = arith.cmpi ne, %1, %c0_i32_0 : i32
    scf.if %2 {
      %cst_10 = arith.constant 0.000000e+00 : f32
      %12 = vector.broadcast %cst_10 : f32 to vector<32x96xf32>
      %c0_11 = arith.constant 0 : index
      %c0_12 = arith.constant 0 : index
      %13 = vector.load %arg7[%c0_11, %c0_12] : memref<32x96xf32, #tpu.memory_space<vmem>>, vector<32x96xf32>
      tpu.vector_store %arg7[%c0_11, %c0_12], %12 {strides = array<i32>} : memref<32x96xf32, #tpu.memory_space<vmem>>, vector<32x96xf32>,
    } else {
    }
    %c0 = arith.constant 0 : index
    %c0_1 = arith.constant 0 : index
    %3 = vector.load %arg7[%c0, %c0_1] : memref<32x96xf32, #tpu.memory_space<vmem>>, vector<32x96xf32>
    %c0_2 = arith.constant 0 : index
    %c0_3 = arith.constant 0 : index
    %4 = vector.load %arg3[%c0_2, %c0_3] : memref<32x32xf32, #tpu.memory_space<vmem>>, vector<32x32xf32>
    %c0_4 = arith.constant 0 : index
    %c0_5 = arith.constant 0 : index
    %5 = vector.load %arg4[%c0_4, %c0_5] : memref<32x96xf32, #tpu.memory_space<vmem>>, vector<32x96xf32>
    %cst = arith.constant dense<0.000000e+00> : vector<32x96xf32>
    %6 = tpu.matmul %4, %5, %cst {dimension_numbers = #tpu.dot_dimension_numbers<[1], [0], [0], [1], [0, 0, 1, 1], [], []>} : vector<32x32xf32>, vector<32x96xf32>, vector<32x96xf32> -> vector<32x96xf32>
    %7 = arith.addf %3, %6 : vector<32x96xf32>
    %c0_6 = arith.constant 0 : index
    %c0_7 = arith.constant 0 : index
    %8 = vector.load %arg7[%c0_6, %c0_7] : memref<32x96xf32, #tpu.memory_space<vmem>>, vector<32x96xf32>
    tpu.vector_store %arg7[%c0_6, %c0_7], %7 {strides = array<i32>} : memref<32x96xf32, #tpu.memory_space<vmem>>, vector<32x96xf32>,
    %c0_i32_8 = arith.constant 0 : i32
    %9 = arith.cmpi eq, %arg2, %c0_i32_8 : i32
    %10 = arith.extui %9 : i1 to i32
    %c0_i32_9 = arith.constant 0 : i32
    %11 = arith.cmpi ne, %10, %c0_i32_9 : i32
    scf.if %11 {
      %c0_10 = arith.constant 0 : index
      %c0_11 = arith.constant 0 : index
      %12 = vector.load %arg7[%c0_10, %c0_11] : memref<32x96xf32, #tpu.memory_space<vmem>>, vector<32x96xf32>
      %c0_12 = arith.constant 0 : index
      %c0_13 = arith.constant 0 : index
      %13 = vector.load %arg5[%c0_12, %c0_13] : memref<1x96xf32, #tpu.memory_space<vmem>>, vector<1x96xf32>
      %14 = vector.broadcast %13 : vector<1x96xf32> to vector<32x96xf32>
      %15 = arith.addf %12, %14 : vector<32x96xf32>
      %c0_14 = arith.constant 0 : index
      %c0_15 = arith.constant 0 : index
      %16 = vector.load %arg6[%c0_14, %c0_15] : memref<32x96xf32, #tpu.memory_space<vmem>>, vector<32x96xf32>
      tpu.vector_store %arg6[%c0_14, %c0_15], %15 {strides = array<i32>} : memref<32x96xf32, #tpu.memory_space<vmem>>, vector<32x96xf32>,
    } else {
    }
    return
  }
  func.func @transform_0(%arg0: i32, %arg1: i32, %arg2: i32) -> (i32, i32) {
    %c0_i32 = arith.constant 0 : i32
    return %arg0, %arg2 : i32, i32
  }
  func.func @transform_1(%arg0: i32, %arg1: i32, %arg2: i32) -> (i32, i32) {
    %c0_i32 = arith.constant 0 : i32
    return %arg2, %arg1 : i32, i32
  }
  func.func @transform_2(%arg0: i32, %arg1: i32, %arg2: i32) -> (i32, i32) {
    %c0_i32 = arith.constant 0 : i32
    %c0_i32_0 = arith.constant 0 : i32
    return %c0_i32, %arg1 : i32, i32
  }
  func.func @transform_3(%arg0: i32, %arg1: i32, %arg2: i32) -> (i32, i32) {
    %c0_i32 = arith.constant 0 : i32
    return %arg0, %arg1 : i32, i32
  }
}

module attributes {stable_mosaic.version = 11 : i64} {
  func.func @_dilated_attn_kernel(%arg0: i32, %arg1: memref<4x4x192xf32, #tpu.memory_space<vmem>>, %arg2: memref<4x4x64xf32, #tpu.memory_space<vmem>>) attributes {dimension_semantics = [#tpu.dimension_semantics<parallel>], iteration_bounds = array<i64: 1>, scalar_prefetch = 0 : i64, scratch_operands = 0 : i64, tpu.core_type = #tpu.core_type<tc>, window_params = [{transform_indices = @transform_0, window_bounds = array<i64: 4, 4, 192>}, {transform_indices = @transform_1, window_bounds = array<i64: 4, 4, 64>}]} {
    %c0 = arith.constant 0 : index
    %c0_0 = arith.constant 0 : index
    %c0_1 = arith.constant 0 : index
    %0 = vector.load %arg1[%c0, %c0_0, %c0_1] : memref<4x4x192xf32, #tpu.memory_space<vmem>>, vector<4x4x192xf32>
    %1 = vector.extract_strided_slice %0 {offsets = [0, 0, 0], sizes = [4, 4, 96], strides = [1, 1, 1]} : vector<4x4x192xf32> to vector<4x4x96xf32>
    %2 = vector.extract_strided_slice %0 {offsets = [0, 0, 96], sizes = [4, 4, 96], strides = [1, 1, 1]} : vector<4x4x192xf32> to vector<4x4x96xf32>
    %3 = vector.extract_strided_slice %1 {offsets = [0, 0, 0], sizes = [4, 4, 8], strides = [1, 1, 1]} : vector<4x4x96xf32> to vector<4x4x8xf32>
    %4 = vector.extract_strided_slice %1 {offsets = [0, 0, 32], sizes = [4, 4, 8], strides = [1, 1, 1]} : vector<4x4x96xf32> to vector<4x4x8xf32>
    %5 = vector.extract_strided_slice %1 {offsets = [0, 0, 64], sizes = [4, 4, 8], strides = [1, 1, 1]} : vector<4x4x96xf32> to vector<4x4x8xf32>
    %6 = vector.extract_strided_slice %2 {offsets = [0, 0, 8], sizes = [4, 4, 8], strides = [1, 1, 1]} : vector<4x4x96xf32> to vector<4x4x8xf32>
    %7 = vector.extract_strided_slice %2 {offsets = [0, 0, 40], sizes = [4, 4, 8], strides = [1, 1, 1]} : vector<4x4x96xf32> to vector<4x4x8xf32>
    %8 = vector.extract_strided_slice %2 {offsets = [0, 0, 72], sizes = [4, 4, 8], strides = [1, 1, 1]} : vector<4x4x96xf32> to vector<4x4x8xf32>
    %9 = vector.extract_strided_slice %1 {offsets = [0, 0, 16], sizes = [4, 4, 8], strides = [1, 1, 1]} : vector<4x4x96xf32> to vector<4x4x8xf32>
    %10 = vector.extract_strided_slice %1 {offsets = [0, 0, 48], sizes = [4, 4, 8], strides = [1, 1, 1]} : vector<4x4x96xf32> to vector<4x4x8xf32>
    %11 = vector.extract_strided_slice %1 {offsets = [0, 0, 80], sizes = [4, 4, 8], strides = [1, 1, 1]} : vector<4x4x96xf32> to vector<4x4x8xf32>
    %12 = vector.extract_strided_slice %2 {offsets = [0, 0, 24], sizes = [4, 4, 8], strides = [1, 1, 1]} : vector<4x4x96xf32> to vector<4x4x8xf32>
    %13 = vector.extract_strided_slice %2 {offsets = [0, 0, 56], sizes = [4, 4, 8], strides = [1, 1, 1]} : vector<4x4x96xf32> to vector<4x4x8xf32>
    %14 = vector.extract_strided_slice %2 {offsets = [0, 0, 88], sizes = [4, 4, 8], strides = [1, 1, 1]} : vector<4x4x96xf32> to vector<4x4x8xf32>
    %15 = vector.shape_cast %5 : vector<4x4x8xf32> to vector<4x1x4x8xf32>
    %16 = vector.shape_cast %8 : vector<4x4x8xf32> to vector<4x1x4x8xf32>
    %17 = vector.shape_cast %11 : vector<4x4x8xf32> to vector<4x1x4x8xf32>
    %18 = vector.shape_cast %14 : vector<4x4x8xf32> to vector<4x1x4x8xf32>
    %19 = tpu.concatenate %15, %16, %17, %18 in 1 : vector<4x1x4x8xf32>, vector<4x1x4x8xf32>, vector<4x1x4x8xf32>, vector<4x1x4x8xf32> -> vector<4x4x4x8xf32>
    %20 = vector.shape_cast %19 : vector<4x4x4x8xf32> to vector<16x4x8xf32>
    %21 = vector.shape_cast %3 : vector<4x4x8xf32> to vector<4x1x4x8xf32>
    %22 = vector.shape_cast %6 : vector<4x4x8xf32> to vector<4x1x4x8xf32>
    %23 = vector.shape_cast %9 : vector<4x4x8xf32> to vector<4x1x4x8xf32>
    %24 = vector.shape_cast %12 : vector<4x4x8xf32> to vector<4x1x4x8xf32>
    %25 = tpu.concatenate %21, %22, %23, %24 in 1 : vector<4x1x4x8xf32>, vector<4x1x4x8xf32>, vector<4x1x4x8xf32>, vector<4x1x4x8xf32> -> vector<4x4x4x8xf32>
    %26 = vector.shape_cast %25 : vector<4x4x4x8xf32> to vector<16x4x8xf32>
    %27 = vector.shape_cast %4 : vector<4x4x8xf32> to vector<4x1x4x8xf32>
    %28 = vector.shape_cast %7 : vector<4x4x8xf32> to vector<4x1x4x8xf32>
    %29 = vector.shape_cast %10 : vector<4x4x8xf32> to vector<4x1x4x8xf32>
    %30 = vector.shape_cast %13 : vector<4x4x8xf32> to vector<4x1x4x8xf32>
    %31 = tpu.concatenate %27, %28, %29, %30 in 1 : vector<4x1x4x8xf32>, vector<4x1x4x8xf32>, vector<4x1x4x8xf32>, vector<4x1x4x8xf32> -> vector<4x4x4x8xf32>
    %32 = vector.shape_cast %31 : vector<4x4x4x8xf32> to vector<16x4x8xf32>
    "tpu.trace_start"() <{level = 10 : i32, message = "bpd,bqd->bpq"}> : () -> ()
    %cst = arith.constant dense<0.000000e+00> : vector<16x4x4xf32>
    %33 = tpu.matmul %20, %26, %cst {dimension_numbers = #tpu.dot_dimension_numbers<[2], [2], [1], [1], [0, 0, 0, 1, 1, 1], [0], [0]>} : vector<16x4x8xf32>, vector<16x4x8xf32>, vector<16x4x4xf32> -> vector<16x4x4xf32>
    "tpu.trace_stop"() : () -> ()
    %cst_2 = arith.constant 0.353553385 : f32
    %34 = vector.broadcast %cst_2 : f32 to vector<16x4x4xf32>
    %35 = arith.mulf %33, %34 : vector<16x4x4xf32>
    %cst_3 = arith.constant dense<0xFF800000> : vector<16x4xf32>
    %36 = vector.multi_reduction <maximumf>, %35, %cst_3 [2] : vector<16x4x4xf32> to vector<16x4xf32>
    %37 = vector.shape_cast %36 : vector<16x4xf32> to vector<16x4x1xf32>
    %38 = vector.broadcast %37 : vector<16x4x1xf32> to vector<16x4x4xf32>
    %39 = arith.subf %35, %38 : vector<16x4x4xf32>
    %40 = math.exp %39 : vector<16x4x4xf32>
    %cst_4 = arith.constant dense<0.000000e+00> : vector<16x4xf32>
    %41 = vector.multi_reduction <add>, %40, %cst_4 [2] : vector<16x4x4xf32> to vector<16x4xf32>
    %42 = vector.shape_cast %41 : vector<16x4xf32> to vector<16x4x1xf32>
    %43 = tpu.reciprocal %42 {approx = true} : vector<16x4x1xf32> -> vector<16x4x1xf32>
    %44 = arith.mulf %42, %43 : vector<16x4x1xf32>
    %cst_5 = arith.constant 2.000000e+00 : f32
    %45 = vector.broadcast %cst_5 : f32 to vector<16x4x1xf32>
    %46 = arith.subf %45, %44 : vector<16x4x1xf32>
    %47 = arith.mulf %43, %46 : vector<16x4x1xf32>
    %48 = vector.broadcast %47 : vector<16x4x1xf32> to vector<16x4x4xf32>
    %49 = arith.mulf %40, %48 : vector<16x4x4xf32>
    "tpu.trace_start"() <{level = 10 : i32, message = "bpq,bqd->bpd"}> : () -> ()
    %cst_6 = arith.constant dense<0.000000e+00> : vector<16x4x8xf32>
    %50 = tpu.matmul %49, %32, %cst_6 {dimension_numbers = #tpu.dot_dimension_numbers<[2], [1], [1], [2], [0, 0, 0, 1, 1, 2], [0], [0]>} : vector<16x4x4xf32>, vector<16x4x8xf32>, vector<16x4x8xf32> -> vector<16x4x8xf32>
    "tpu.trace_stop"() : () -> ()
    %51 = vector.shape_cast %50 : vector<16x4x8xf32> to vector<4x4x4x8xf32>
    %cst_7 = arith.constant 0.000000e+00 : f32
    %52 = vector.broadcast %cst_7 : f32 to vector<4x4x8xf32>
    %53 = vector.extract_strided_slice %51 {offsets = [0, 0, 0, 0], sizes = [4, 1, 4, 8], strides = [1, 1, 1, 1]} : vector<4x4x4x8xf32> to vector<4x1x4x8xf32>
    %54 = vector.shape_cast %53 : vector<4x1x4x8xf32> to vector<4x4x8xf32>
    %55 = vector.extract_strided_slice %51 {offsets = [0, 2, 0, 0], sizes = [4, 1, 4, 8], strides = [1, 1, 1, 1]} : vector<4x4x4x8xf32> to vector<4x1x4x8xf32>
    %56 = vector.shape_cast %55 : vector<4x1x4x8xf32> to vector<4x4x8xf32>
    %57 = vector.extract_strided_slice %51 {offsets = [0, 1, 0, 0], sizes = [4, 1, 4, 8], strides = [1, 1, 1, 1]} : vector<4x4x4x8xf32> to vector<4x1x4x8xf32>
    %58 = vector.shape_cast %57 : vector<4x1x4x8xf32> to vector<4x4x8xf32>
    %59 = vector.extract_strided_slice %51 {offsets = [0, 3, 0, 0], sizes = [4, 1, 4, 8], strides = [1, 1, 1, 1]} : vector<4x4x4x8xf32> to vector<4x1x4x8xf32>
    %60 = vector.shape_cast %59 : vector<4x1x4x8xf32> to vector<4x4x8xf32>
    %61 = tpu.concatenate %54, %52, %56, %52, %52, %58, %52, %60 in 2 : vector<4x4x8xf32>, vector<4x4x8xf32>, vector<4x4x8xf32>, vector<4x4x8xf32>, vector<4x4x8xf32>, vector<4x4x8xf32>, vector<4x4x8xf32>, vector<4x4x8xf32> -> vector<4x4x64xf32>
    %c0_8 = arith.constant 0 : index
    %c0_9 = arith.constant 0 : index
    %c0_10 = arith.constant 0 : index
    %62 = vector.load %arg2[%c0_8, %c0_9, %c0_10] : memref<4x4x64xf32, #tpu.memory_space<vmem>>, vector<4x4x64xf32>
    tpu.vector_store %arg2[%c0_8, %c0_9, %c0_10], %61 {strides = array<i32>} : memref<4x4x64xf32, #tpu.memory_space<vmem>>, vector<4x4x64xf32>,
    return
  }
  func.func @transform_0(%arg0: i32) -> (i32, i32, i32) {
    %c0_i32 = arith.constant 0 : i32
    %c0_i32_0 = arith.constant 0 : i32
    %c0_i32_1 = arith.constant 0 : i32
    return %arg0, %c0_i32, %c0_i32_0 : i32, i32, i32
  }
  func.func @transform_1(%arg0: i32) -> (i32, i32, i32) {
    %c0_i32 = arith.constant 0 : i32
    %c0_i32_0 = arith.constant 0 : i32
    %c0_i32_1 = arith.constant 0 : i32
    return %arg0, %c0_i32, %c0_i32_0 : i32, i32, i32
  }
}

</mosaic_0001>

<bundles_post_ra>
// kernel: dilated_attention_forward.2
= control target key start
LH: loop header
LB: loop body
LE: loop exit
PB: predicated region body
PF: predicated region fallthrough
CT: control target
= control target key end

     0   :  { %vm35_vm0 = vcmask 261120   ;;  %vm18_vm1 = vcmask 785408   ;;  %v208_v3 = vmov 0.0   ;;  %s284_s1 = inlined_call_operand.vmem [shape: f32[32,96], index: 1, kind: input, shape index: {}]   ;;  %s285_s0 = inlined_call_operand.vmem [shape: f32[32,32], index: 0, kind: input, shape index: {}]   ;;  %s286_s2 = inlined_call_operand.vmem [shape: f32[1,96], index: 2, kind: input, shape index: {}]   ;;  %s287_s3 = inlined_call_operand.vmem [shape: f32[32,96], index: 3, kind: output, shape index: {}]  }
   0x1   :  { %v31_v0 = vld [vmem:[%s284_s1] sm:$0xff]  ;;  %v32_v1 = vld [vmem:[%s284_s1 + $0x8] sm:$0xff]  ;;  %v33_v2 = vld [vmem:[%s284_s1 + $0x10] sm:$0xff]  ;;  %20 = vst.msk [vmem:[#allocation2 + $0x8] sm:$0xff] %vm18_vm1, %v208_v3 }
   0x2   :  { %19 = vst.msk [vmem:[#allocation2] sm:$0xff] %vm18_vm1, %v208_v3  ;;  %21 = vst.msk [vmem:[#allocation2 + $0x10] sm:$0xff] %vm18_vm1, %v208_v3  ;;  %v195_v4 = vpack.c.bf16 %v32_v1, %v31_v0  ;;  %v34_v5 = vld [vmem:[%s284_s1 + $0x18] sm:$0xff]  ;;  %v27_v6 = vld [vmem:[%s285_s0] sm:$0xff] }
   0x3   :  { %22 = vst.msk [vmem:[#allocation2 + $0x18] sm:$0xff] %vm18_vm1, %v208_v3  ;;  %v29_v7 = vld [vmem:[%s285_s0 + $0x10] sm:$0xff]  ;;  %v199_v8 = vpack.c.bf16 %v34_v5, %v33_v2  ;;  %189 = vmatprep.mubr.msk.f32.mxu0 %vm35_vm0, %v27_v6  ;;  %v28_v9 = vld [vmem:[%s285_s0 + $0x8] sm:$0xff]  ;;  %v30_v10 = vld [vmem:[%s285_s0 + $0x18] sm:$0xff] }
   0x4   :  { %192 = vmatprep.mubr.msk.f32.mxu1 %vm35_vm0, %v29_v7  ;;  %196 = vmatprep.subr.bf16.mxu0 %v195_v4  ;;  %v172_v23 = vld [vmem:[%s286_s2] ss:$0 sm:$0xff] }
   0x5   :  { %203 = vmatprep.subr.bf16.mxu1 %v195_v4  ;;  %198 = vmatpush3.bf16.msra.mxu0 %v195_v4 }
   0x6   :  { %205 = vmatpush3.bf16.msra.mxu1 %v195_v4  ;;  %200 = vmatprep.subr.bf16.mxu0 %v199_v8 }
   0x7   :  { %204 = vmatprep.subr.bf16.mxu1 %v199_v8 }
   0x8   :  { %v24_v11 = vld [vmem:[#allocation2 + $0x8] sm:$0xff] }
   0x9   :  { %202 = vmatpush3.bf16.msra.mxu0 %v199_v8  ;;  %v23_v13 = vld [vmem:[#allocation2] sm:$0xff]  ;;  %v25_v14 = vld [vmem:[#allocation2 + $0x10] sm:$0xff] }
   0xa   :  { %206 = vmatpush3.bf16.msra.mxu1 %v199_v8  ;;  %v26_v12 = vld [vmem:[#allocation2 + $0x18] sm:$0xff] }
   0xc   :  { %190 = vmatmul.mubr.msk.f32.vlgmr.msra.gmra.mrb[0].mxu0 %vm35_vm0, %v28_v9 }
   0xd   :  { %193 = vmatmul.mubr.msk.f32.vlgmr.msra.gmra.mrb[0].mxu1 %vm35_vm0, %v30_v10 }
  0xdf   :  { %v191_v15 = vpop.f32.mrb[0].mxu0 }
  0xe0   :  { %v194_v16 = vpop.f32.mrb[0].mxu1  ;;  %v134_v17 = vadd.f32 %v191_v15, %v24_v11  ;;  %v114_v19 = vpop.f32.mrb[1].mxu0 }
  0xe1   :  { %v136_v18 = vadd.f32 %v194_v16, %v26_v12  ;;  %v124_v20 = vpop.f32.mrb[1].mxu1  ;;  %v133_v21 = vadd.f32 %v114_v19, %v23_v13 }
  0xe2   :  { %v135_v22 = vadd.f32 %v124_v20, %v25_v14  ;;  %139 = vst.msk [vmem:[#allocation2 + $0x8] sm:$0xff] %vm18_vm1, %v134_v17 }
  0xe3   :  { %141 = vst.msk [vmem:[#allocation2 + $0x18] sm:$0xff] %vm18_vm1, %v136_v18  ;;  %138 = vst.msk [vmem:[#allocation2] sm:$0xff] %vm18_vm1, %v133_v21 }
  0xe4   :  { %140 = vst.msk [vmem:[#allocation2 + $0x10] sm:$0xff] %vm18_vm1, %v135_v22 }
  0xe9   :  { %v146_v24 = vld [vmem:[#allocation2 + $0x8] sm:$0xff] }
  0xea   :  { %v148_v25 = vld [vmem:[#allocation2 + $0x18] sm:$0xff]  ;;  %v157_v26 = vadd.f32 %v172_v23, %v146_v24  ;;  %v145_v28 = vld [vmem:[#allocation2] sm:$0xff] }
  0xeb   :  { %v159_v27 = vadd.f32 %v172_v23, %v148_v25  ;;  %v147_v29 = vld [vmem:[#allocation2 + $0x10] sm:$0xff]  ;;  %v156_v30 = vadd.f32 %v172_v23, %v145_v28 }
  0xec   :  { %v158_v31 = vadd.f32 %v172_v23, %v147_v29  ;;  %161 = vst.msk [vmem:[%s287_s3 + $0x8] sm:$0xff] %vm18_vm1, %v157_v26 }
  0xed   :  { %163 = vst.msk [vmem:[%s287_s3 + $0x18] sm:$0xff] %vm18_vm1, %v159_v27  ;;  %160 = vst.msk [vmem:[%s287_s3] sm:$0xff] %vm18_vm1, %v156_v30 }
  0xee   :  { %162 = vst.msk [vmem:[%s287_s3 + $0x10] sm:$0xff] %vm18_vm1, %v158_v31 }

// kernel: dilated_attention_forward.3
= control target key start
LH: loop header
LB: loop body
LE: loop exit
PB: predicated region body
PF: predicated region fallthrough
CT: control target
= control target key end

     0   :  { %s3270_s10 = smov 88   ;;  %s3271_s11 = smov 72   ;;  %v3274_v13 = vmov 0.0   ;;  %vm122_vm0 = vcmask 64512   ;;  %vm3275_vm1 = vmmov 0   ;;  %vm1584_vm2 = vcmask 1043456   ;;  %s3843_s0 = inlined_call_operand.vmem [shape: f32[4,4,192], index: 0, kind: input, shape index: {}]   ;;  %s3844_s1 = inlined_call_operand.vmem [shape: f32[4,4,64], index: 1, kind: output, shape index: {}]  }
   0x1   :  { %v3298_v0 = vld [vmem:[%s3843_s0] sm:$0xff]  ;;  %v3303_v1 = vld [vmem:[%s3843_s0 + $0x8] sm:$0xff]  ;;  %v3312_v2 = vld [vmem:[%s3843_s0 + $0x10] sm:$0xff]  ;;  %s3272_s16 = smov 112   ;;  %s3273_s17 = smov 64   ;;  %3031 = vmatprep.subr.mxu0 %v3274_v13  ;;  %3036 = vmatprep.subr.mxu1 %v3274_v13  ;;  %vm1353_vm3 = vcmask 27648  }
   0x2   :  { %16 = vrot.lane.b32.xlu0 %v3298_v0, %s3270_s10  ;;  %18 = vrot.lane.b32.xlu1 %v3303_v1, %s3270_s10  ;;  %v3319_v3 = vld [vmem:[%s3843_s0 + $0x18] sm:$0xff]  ;;  %s3276_s0 = smov 24   ;;  %s3277_s18 = smov 8   ;;  %vm1580_vm4 = vcmask 31744   ;;  %vm2864_vm5 = vcmask 130048   ;;  %vm2869_vm6 = vcmask 195584  }
   0x3   :  { %3032 = vmatpush3.xpose.msk.msra.mxu0 %vm122_vm0, %v3298_v0  ;;  %3033 = vmatprep.mubr.msk.f32.mxu0 %vm3275_vm1, %v3274_v13  ;;  %s3278_s19 = smov 104   ;;  %s3279_s20 = smov 120   ;;  %vm2874_vm7 = vcmask 261120   ;;  %vm2879_vm8 = vcmask 326656   ;;  %vm2884_vm9 = vcmask 392192   ;;  %vm2889_vm10 = vcmask 457728  }
   0x4   :  { %3041 = vmatprep.subr.mxu0 %v3274_v13  ;;  %3038 = vmatprep.mubr.msk.f32.mxu1 %vm3275_vm1, %v3274_v13  ;;  %s3280_s21 = smov 32   ;;  %s3281_s22 = smov 96   ;;  %vm2894_vm11 = vcmask 519168  }
   0x5   :  { %s3282_s23 = smov 16   ;;  %s3283_s24 = smov 40  }
   0x6   :  { %28 = vrot.lane.b32.xlu0 %v3298_v0, %s3271_s11  ;;  %30 = vrot.lane.b32.xlu1 %v3303_v1, %s3271_s11  ;;  %s3284_s25 = smov 56  }
   0xa   :  { %32 = vrot.lane.b32.xlu1 %v3312_v2, %s3271_s11  ;;  %20 = vrot.lane.b32.xlu0 %v3312_v2, %s3270_s10 }
   0xe   :  { %22 = vrot.lane.b32.xlu0 %v3319_v3, %s3270_s10  ;;  %34 = vrot.lane.b32.xlu1 %v3319_v3, %s3271_s11 }
  0x12   :  { %48 = vrot.lane.b32.xlu0 %v3298_v0, %s3272_s16 }
  0x74   :  { %v17_v4 = vpop.permute.xlu0 %16  ;;  %v19_v5 = vpop.permute.xlu1 %18 }
  0x75   :  { %v24_v6 = vrot.slane %v17_v4, 4  ;;  %v25_v10 = vrot.slane %v19_v5, 4 }
  0x77   :  { %40 = vrot.lane.b32.xlu1 %v24_v6, %s3273_s17 }
  0x78   :  { %v29_v7 = vpop.permute.xlu0 %28  ;;  %v31_v8 = vpop.permute.xlu1 %30 }
  0x79   :  { %v36_v9 = vrot.slane %v29_v7, 4  ;;  %v37_v11 = vrot.slane %v31_v8, 4 }
  0x7b   :  { %50 = vrot.lane.b32.xlu1 %v3303_v1, %s3272_s16  ;;  %56 = vrot.lane.b32.xlu0 %v36_v9, %s3273_s17 }
  0x7c   :  { %v21_v12 = vpop.permute.xlu0 %20  ;;  %v33_v15 = vpop.permute.xlu1 %32 }
  0x7d   :  { %v26_v14 = vrot.slane %v21_v12, 4  ;;  %v38_v16 = vrot.slane %v33_v15, 4 }
  0x7f   :  { %42 = vrot.lane.b32.xlu0 %v25_v10, %s3273_s17  ;;  %58 = vrot.lane.b32.xlu1 %v37_v11, %s3273_s17 }
  0x80   :  { %v23_v17 = vpop.permute.xlu0 %22  ;;  %v35_v18 = vpop.permute.xlu1 %34 }
  0x81   :  { %v27_v19 = vrot.slane %v23_v17, 4  ;;  %v39_v20 = vrot.slane %v35_v18, 4 }
  0x83   :  { %52 = vrot.lane.b32.xlu0 %v3312_v2, %s3272_s16  ;;  %44 = vrot.lane.b32.xlu1 %v26_v14, %s3273_s17 }
  0x84   :  { %v3351_v21 = vpop.permute.xlu0 %48 }
  0x87   :  { %60 = vrot.lane.b32.xlu0 %v38_v16, %s3273_s17  ;;  %54 = vrot.lane.b32.xlu1 %v3319_v3, %s3272_s16 }
  0x8b   :  { %46 = vrot.lane.b32.xlu0 %v27_v19, %s3273_s17  ;;  %62 = vrot.lane.b32.xlu1 %v39_v20, %s3273_s17 }
  0x8f   :  { %120 = vrot.lane.b32.xlu0 %v3298_v0, %s3273_s17  ;;  %64 = vrot.lane.b32.xlu1 %v3298_v0, %s3276_s0 }
  0x93   :  { %273 = vrot.lane.b32.xlu0 %v3351_v21, %s3273_s17  ;;  %425 = vrot.lane.b32.xlu1 %v3303_v1, %s3273_s17 }
  0x97   :  { %66 = vrot.lane.b32.xlu1 %v3303_v1, %s3276_s0  ;;  %72 = vrot.lane.b32.xlu0 %v3298_v0, %s3277_s18 }
  0x9b   :  { %729 = vrot.lane.b32.xlu1 %v3312_v2, %s3273_s17 }
  0xe9   :  { %v41_v22 = vpop.permute.xlu1 %40 }
  0xea   :  { %197 = vrot.lane.b32.xlu1 %v41_v22, %s3273_s17 }
  0xed   :  { %v3363_v23 = vpop.permute.xlu1 %50  ;;  %v57_v24 = vpop.permute.xlu0 %56 }
  0xee   :  { %68 = vrot.lane.b32.xlu1 %v3312_v2, %s3276_s0  ;;  %577 = vrot.lane.b32.xlu0 %v3363_v23, %s3273_s17 }
  0xf1   :  { %v43_v25 = vpop.permute.xlu0 %42  ;;  %v59_v26 = vpop.permute.xlu1 %58 }
  0xf2   :  { %74 = vrot.lane.b32.xlu0 %v3303_v1, %s3277_s18  ;;  %501 = vrot.lane.b32.xlu1 %v43_v25, %s3273_s17 }
  0xf5   :  { %v3371_v27 = vpop.permute.xlu0 %52  ;;  %v45_v28 = vpop.permute.xlu1 %44 }
  0xf6   :  { %349 = vrot.lane.b32.xlu0 %v57_v24, %s3273_s17  ;;  %1033 = vrot.lane.b32.xlu1 %v3319_v3, %s3273_s17 }
  0xf9   :  { %v61_v29 = vpop.permute.xlu0 %60  ;;  %v3376_v30 = vpop.permute.xlu1 %54 }
  0xfa   :  { %805 = vrot.lane.b32.xlu1 %v45_v28, %s3273_s17  ;;  %881 = vrot.lane.b32.xlu0 %v3371_v27, %s3273_s17 }
  0xfd   :  { %v47_v31 = vpop.permute.xlu0 %46  ;;  %v63_v32 = vpop.permute.xlu1 %62 }
  0xfe   :  { %70 = vrot.lane.b32.xlu1 %v3319_v3, %s3276_s0  ;;  %653 = vrot.lane.b32.xlu0 %v59_v26, %s3273_s17 }
 0x101   :  { %v121_v33 = vpop.permute.xlu0 %120  ;;  %v65_v34 = vpop.permute.xlu1 %64 }
 0x102   :  { %76 = vrot.lane.b32.xlu0 %v3312_v2, %s3277_s18  ;;  %1109 = vrot.lane.b32.xlu1 %v47_v31, %s3273_s17 }
 0x103   :  { %3034 = vmatmul.mubr.msk.f32.vlgmr.msra.gmra.mrb[0].mxu0 %vm122_vm0, %v121_v33  ;;  %3037 = vmatpush3.xpose.msk.msra.mxu1 %vm122_vm0, %v65_v34 }
 0x104   :  { %3042 = vmatpush3.xpose.msk.msra.mxu0 %vm122_vm0, %v3351_v21  ;;  %3043 = vmatprep.mubr.msk.f32.mxu0 %vm3275_vm1, %v3274_v13 }
 0x105   :  { %v274_v35 = vpop.permute.xlu0 %273  ;;  %3051 = vmatprep.subr.mxu0 %v3274_v13  ;;  %3046 = vmatprep.subr.mxu1 %v3274_v13  ;;  %v426_v36 = vpop.permute.xlu1 %425 }
 0x106   :  { %957 = vrot.lane.b32.xlu0 %v61_v29, %s3273_s17  ;;  %1261 = vrot.lane.b32.xlu1 %v63_v32, %s3273_s17 }
 0x107   :  { %3044 = vmatmul.mubr.msk.f32.vlgmr.msra.gmra.mrb[2].mxu0 %vm122_vm0, %v274_v35 }
 0x108   :  { %3052 = vmatpush3.xpose.msk.msra.mxu0 %vm122_vm0, %v3303_v1  ;;  %3053 = vmatprep.mubr.msk.f32.mxu0 %vm3275_vm1, %v3274_v13 }
 0x109   :  { %3061 = vmatprep.subr.mxu0 %v3274_v13  ;;  %v67_v37 = vpop.permute.xlu1 %66  ;;  %v73_v39 = vpop.permute.xlu0 %72 }
 0x10a   :  { %1185 = vrot.lane.b32.xlu0 %v3376_v30, %s3273_s17  ;;  %92 = vrot.lane.b32.xlu1 %v3298_v0, %s3278_s19 }
 0x10b   :  { %3054 = vmatmul.mubr.msk.f32.vlgmr.msra.gmra.mrb[4].mxu0 %vm122_vm0, %v426_v36 }
 0x10c   :  { %3062 = vmatpush3.xpose.msk.msra.mxu0 %vm122_vm0, %v3363_v23  ;;  %3063 = vmatprep.mubr.msk.f32.mxu0 %vm3275_vm1, %v3274_v13 }
 0x10d   :  { %3071 = vmatprep.subr.mxu0 %v3274_v13  ;;  %v730_v38 = vpop.permute.xlu1 %729 }
 0x10e   :  { %78 = vrot.lane.b32.xlu0 %v3319_v3, %s3277_s18  ;;  %94 = vrot.lane.b32.xlu1 %v3303_v1, %s3278_s19 }
 0x112   :  { %80 = vrot.lane.b32.xlu0 %v3298_v0, %s3279_s20  ;;  %86 = vrot.lane.b32.xlu1 %v3319_v3, %s3279_s20 }
 0x116   :  { %82 = vrot.lane.b32.xlu0 %v3303_v1, %s3279_s20 }
 0x11a   :  { %84 = vrot.lane.b32.xlu0 %v3312_v2, %s3279_s20 }
 0x11e   :  { %96 = vrot.lane.b32.xlu0 %v3312_v2, %s3278_s19 }
 0x122   :  { %98 = vrot.lane.b32.xlu0 %v3319_v3, %s3278_s19 }
 0x15c   :  { %v198_v40 = vpop.permute.xlu1 %197 }
 0x15d   :  { %3039 = vmatmul.mubr.msk.f32.vlgmr.msra.gmra.mrb[0].mxu1 %vm122_vm0, %v198_v40 }
 0x15e   :  { %3047 = vmatpush3.xpose.msk.msra.mxu1 %vm122_vm0, %v73_v39  ;;  %3048 = vmatprep.mubr.msk.f32.mxu1 %vm3275_vm1, %v3274_v13 }
 0x15f   :  { %3056 = vmatprep.subr.mxu1 %v3274_v13 }
 0x160   :  { %v69_v41 = vpop.permute.xlu1 %68  ;;  %v578_v42 = vpop.permute.xlu0 %577 }
 0x161   :  { %3064 = vmatmul.mubr.msk.f32.vlgmr.msra.gmra.mrb[6].mxu0 %vm122_vm0, %v578_v42 }
 0x162   :  { %3072 = vmatpush3.xpose.msk.msra.mxu0 %vm122_vm0, %v3312_v2  ;;  %3073 = vmatprep.mubr.msk.f32.mxu0 %vm3275_vm1, %v3274_v13 }
 0x163   :  { %3081 = vmatprep.subr.mxu0 %v3274_v13 }
 0x164   :  { %v502_v43 = vpop.permute.xlu1 %501  ;;  %v75_v44 = vpop.permute.xlu0 %74 }
 0x165   :  { %3074 = vmatmul.mubr.msk.f32.vlgmr.msra.gmra.mrb[8].mxu0 %vm122_vm0, %v730_v38 }
 0x166   :  { %3082 = vmatpush3.xpose.msk.msra.mxu0 %vm122_vm0, %v3371_v27  ;;  %3083 = vmatprep.mubr.msk.f32.mxu0 %vm3275_vm1, %v3274_v13 }
 0x167   :  { %3091 = vmatprep.subr.mxu0 %v3274_v13 }
 0x168   :  { %v1034_v45 = vpop.permute.xlu1 %1033  ;;  %v350_v46 = vpop.permute.xlu0 %349 }
 0x169   :  { %3049 = vmatmul.mubr.msk.f32.vlgmr.msra.gmra.mrb[2].mxu1 %vm122_vm0, %v350_v46 }
 0x16a   :  { %3057 = vmatpush3.xpose.msk.msra.mxu1 %vm122_vm0, %v67_v37  ;;  %3058 = vmatprep.mubr.msk.f32.mxu1 %vm3275_vm1, %v3274_v13 }
 0x16b   :  { %3066 = vmatprep.subr.mxu1 %v3274_v13 }
 0x16c   :  { %v806_v47 = vpop.permute.xlu1 %805  ;;  %v882_v48 = vpop.permute.xlu0 %881 }
 0x16d   :  { %3059 = vmatmul.mubr.msk.f32.vlgmr.msra.gmra.mrb[4].mxu1 %vm122_vm0, %v502_v43  ;;  %3084 = vmatmul.mubr.msk.f32.vlgmr.msra.gmra.mrb[10].mxu0 %vm122_vm0, %v882_v48 }
 0x16e   :  { %3067 = vmatpush3.xpose.msk.msra.mxu1 %vm122_vm0, %v75_v44  ;;  %3092 = vmatpush3.xpose.msk.msra.mxu0 %vm122_vm0, %v3319_v3 }
 0x16f   :  { %3068 = vmatprep.mubr.msk.f32.mxu1 %vm3275_vm1, %v3274_v13  ;;  %3076 = vmatprep.subr.mxu1 %v3274_v13 }
 0x170   :  { %v71_v49 = vpop.permute.xlu1 %70  ;;  %v654_v50 = vpop.permute.xlu0 %653  ;;  %3093 = vmatprep.mubr.msk.f32.mxu0 %vm3275_vm1, %v3274_v13  ;;  %3101 = vmatprep.subr.mxu0 %v3274_v13 }
 0x171   :  { %3069 = vmatmul.mubr.msk.f32.vlgmr.msra.gmra.mrb[6].mxu1 %vm122_vm0, %v654_v50  ;;  %3094 = vmatmul.mubr.msk.f32.vlgmr.msra.gmra.mrb[12].mxu0 %vm122_vm0, %v1034_v45 }
 0x172   :  { %3077 = vmatpush3.xpose.msk.msra.mxu1 %vm122_vm0, %v69_v41  ;;  %3102 = vmatpush3.xpose.msk.msra.mxu0 %vm122_vm0, %v3376_v30 }
 0x173   :  { %3078 = vmatprep.mubr.msk.f32.mxu1 %vm3275_vm1, %v3274_v13  ;;  %3086 = vmatprep.subr.mxu1 %v3274_v13 }
 0x174   :  { %v1110_v51 = vpop.permute.xlu1 %1109  ;;  %v77_v52 = vpop.permute.xlu0 %76  ;;  %3103 = vmatprep.mubr.msk.f32.mxu0 %vm3275_vm1, %v3274_v13  ;;  %3111 = vmatprep.subr.mxu0 %v3274_v13 }
 0x175   :  { %3079 = vmatmul.mubr.msk.f32.vlgmr.msra.gmra.mrb[8].mxu1 %vm122_vm0, %v806_v47 }
 0x176   :  { %3087 = vmatpush3.xpose.msk.msra.mxu1 %vm122_vm0, %v77_v52  ;;  %3088 = vmatprep.mubr.msk.f32.mxu1 %vm3275_vm1, %v3274_v13 }
 0x177   :  { %3096 = vmatprep.subr.mxu1 %v3274_v13 }
 0x178   :  { %v1262_v53 = vpop.permute.xlu1 %1261  ;;  %v958_v54 = vpop.permute.xlu0 %957 }
 0x179   :  { %3089 = vmatmul.mubr.msk.f32.vlgmr.msra.gmra.mrb[10].mxu1 %vm122_vm0, %v958_v54 }
 0x17a   :  { %3097 = vmatpush3.xpose.msk.msra.mxu1 %vm122_vm0, %v71_v49  ;;  %3098 = vmatprep.mubr.msk.f32.mxu1 %vm3275_vm1, %v3274_v13 }
 0x17b   :  { %3106 = vmatprep.subr.mxu1 %v3274_v13 }
 0x17c   :  { %v93_v55 = vpop.permute.xlu1 %92  ;;  %v1186_v56 = vpop.permute.xlu0 %1185 }
 0x17d   :  { %v100_v57 = vrot.slane %v93_v55, 4  ;;  %3104 = vmatmul.mubr.msk.f32.vlgmr.msra.gmra.mrb[14].mxu0 %vm122_vm0, %v1186_v56  ;;  %3099 = vmatmul.mubr.msk.f32.vlgmr.msra.gmra.mrb[12].mxu1 %vm122_vm0, %v1110_v51 }
 0x17e   :  { %3108 = vmatprep.mubr.msk.f32.mxu1 %vm3275_vm1, %v3274_v13  ;;  %3113 = vmatprep.mubr.msk.f32.mxu0 %vm3275_vm1, %v3274_v13 }
 0x17f   :  { %112 = vrot.lane.b32.xlu1 %v100_v57, %s3280_s21 }
 0x180   :  { %v95_v58 = vpop.permute.xlu1 %94  ;;  %v79_v59 = vpop.permute.xlu0 %78 }
 0x181   :  { %3107 = vmatpush3.xpose.msk.msra.mxu1 %vm122_vm0, %v79_v59  ;;  %v101_v6 = vrot.slane %v95_v58, 4 }
 0x182   :  { %3116 = vmatprep.subr.mxu1 %v3274_v13 }
 0x184   :  { %v87_v60 = vpop.permute.xlu1 %86  ;;  %3109 = vmatmul.mubr.msk.f32.vlgmr.msra.gmra.mrb[14].mxu1 %vm122_vm0, %v1262_v53  ;;  %v81_v61 = vpop.permute.xlu0 %80 }
 0x185   :  { %v91_v62 = vrot.slane %v87_v60, 4  ;;  %v88_v63 = vrot.slane %v81_v61, 4  ;;  %3118 = vmatprep.mubr.msk.f32.mxu1 %vm3275_vm1, %v3274_v13 }
 0x187   :  { %110 = vrot.lane.b32.xlu1 %v91_v62, %s3280_s21  ;;  %104 = vrot.lane.b32.xlu0 %v88_v63, %s3280_s21 }
 0x188   :  { %v83_v4 = vpop.permute.xlu0 %82 }
 0x189   :  { %v89_v5 = vrot.slane %v83_v4, 4 }
 0x18b   :  { %1578 = vrot.lane.b32.xlu1 %v3298_v0, %s3281_s22  ;;  %106 = vrot.lane.b32.xlu0 %v89_v5, %s3280_s21 }
 0x18c   :  { %v85_v7 = vpop.permute.xlu0 %84 }
 0x18d   :  { %v90_v8 = vrot.slane %v85_v7, 4 }
 0x18f   :  { %1888 = vrot.lane.b32.xlu1 %v3303_v1, %s3281_s22  ;;  %114 = vrot.lane.b32.xlu0 %v101_v6, %s3280_s21 }
 0x190   :  { %v97_v9 = vpop.permute.xlu0 %96 }
 0x191   :  { %v102_v10 = vrot.slane %v97_v9, 4 }
 0x193   :  { %2042 = vrot.lane.b32.xlu1 %v3363_v23, %s3281_s22  ;;  %108 = vrot.lane.b32.xlu0 %v90_v8, %s3280_s21 }
 0x194   :  { %v99_v11 = vpop.permute.xlu0 %98 }
 0x195   :  { %v103_v0 = vrot.slane %v99_v11, 4 }
 0x197   :  { %116 = vrot.lane.b32.xlu0 %v102_v10, %s3280_s21 }
 0x19b   :  { %118 = vrot.lane.b32.xlu0 %v103_v0, %s3280_s21 }
 0x19f   :  { %1734 = vrot.lane.b32.xlu0 %v3351_v21, %s3281_s22 }
 0x1d6   :  { %v193_v1 = vpop.f32.mrb[0].mxu0 }
 0x1d7   :  { %v3035_v12 = vpop.f32.mrb[1].mxu0  ;;  %v3513_v24 = vmul.f32 0.35355338, %v193_v1 }
 0x1d9   :  { %v1354_v25 = vsel %vm1353_vm3, %v3513_v24, -inf }
 0x1da   :  { %v345_v14 = vpop.f32.mrb[2].mxu0 }
 0x1db   :  { %v3045_v15 = vpop.f32.mrb[3].mxu0  ;;  %v3517_v26 = vmul.f32 0.35355338, %v345_v14 }
 0x1dd   :  { %v1360_v28 = vsel %vm1353_vm3, %v3517_v26, -inf }
 0x1de   :  { %v497_v16 = vpop.f32.mrb[4].mxu0 }
 0x1df   :  { %v3055_v17 = vpop.f32.mrb[5].mxu0  ;;  %v3521_v29 = vmul.f32 0.35355338, %v497_v16 }
 0x1f1   :  { %v113_v18 = vpop.permute.xlu1 %112 }
 0x1f9   :  { %v3501_v19 = vpop.permute.xlu1 %110  ;;  %v105_v20 = vpop.permute.xlu0 %104 }
 0x1fa   :  { %1657 = vrot.lane.b32.xlu1 %v105_v20, %s3281_s22 }
 0x1fd   :  { %v107_v22 = vpop.permute.xlu0 %106  ;;  %v1579_v23 = vpop.permute.xlu1 %1578 }
 0x1fe   :  { %1811 = vrot.lane.b32.xlu1 %v113_v18, %s3281_s22  ;;  %1965 = vrot.lane.b32.xlu0 %v107_v22, %s3281_s22 }
 0x1ff   :  { %3112 = vmatpush3.msk.msra.mxu0 %vm1584_vm2, %v1579_v23 }
 0x200   :  { %3121 = vmatprep.subr.mxu0 %v3274_v13 }
 0x201   :  { %v115_v21 = vpop.permute.xlu0 %114  ;;  %v3561_v1 = vpop.permute.xlu1 %1888 }
 0x202   :  { %2196 = vrot.lane.b32.xlu1 %v3312_v2, %s3281_s22  ;;  %2119 = vrot.lane.b32.xlu0 %v115_v21, %s3281_s22  ;;  %v1366_v2 = vsel %vm1353_vm3, %v3521_v29, -inf }
 0x205   :  { %v3569_v16 = vpop.permute.xlu1 %2042  ;;  %v109_v18 = vpop.permute.xlu0 %108 }
 0x206   :  { %2350 = vrot.lane.b32.xlu1 %v3371_v27, %s3281_s22 }
 0x209   :  { %v3575_v20 = vpop.permute.xlu0 %116 }
 0x20d   :  { %v3579_v23 = vpop.permute.xlu0 %118 }
 0x221   :  { %1355 = vmax.xlane.f32.xlu0 %v1354_v25  ;;  %v3583_v25 = vpop.permute.xlu0 %1734 }
 0x22a   :  { %1361 = vmax.xlane.f32.xlu1 %v1360_v28 }
 0x22e   :  { %1367 = vmax.xlane.f32.xlu1 %v1366_v2 }
 0x230   :  { %v3525_v27 = vpop.f32.mrb[0].mxu1 }
 0x231   :  { %v3040_v31 = vpop.f32.mrb[1].mxu1 }
 0x234   :  { %v649_v32 = vpop.f32.mrb[6].mxu0 }
 0x235   :  { %v3527_v33 = vmul.f32 0.35355338, %v649_v32  ;;  %v3065_v34 = vpop.f32.mrb[7].mxu0 }
 0x237   :  { %v1372_v35 = vsel %vm1353_vm3, %v3527_v33, -inf }
 0x238   :  { %1373 = vmax.xlane.f32.xlu0 %v1372_v35  ;;  %v801_v36 = vpop.f32.mrb[8].mxu0 }
 0x239   :  { %v3531_v37 = vmul.f32 0.35355338, %v801_v36  ;;  %v3075_v38 = vpop.f32.mrb[9].mxu0 }
 0x23b   :  { %v1378_v39 = vsel %vm1353_vm3, %v3531_v37, -inf }
 0x23c   :  { %v421_v40 = vpop.f32.mrb[2].mxu1  ;;  %1379 = vmax.xlane.f32.xlu1 %v1378_v39 }
 0x23d   :  { %v3050_v41 = vpop.f32.mrb[3].mxu1  ;;  %v3545_v63 = vmul.f32 0.35355338, %v421_v40 }
 0x23f   :  { %v1363_v7 = vsel %vm1353_vm3, %v3545_v63, -inf }
 0x240   :  { %v573_v42 = vpop.f32.mrb[4].mxu1  ;;  %v953_v43 = vpop.f32.mrb[10].mxu0 }
 0x241   :  { %v3535_v44 = vmul.f32 0.35355338, %v953_v43  ;;  %v3060_v45 = vpop.f32.mrb[5].mxu1  ;;  %v3085_v46 = vpop.f32.mrb[11].mxu0  ;;  %v3549_v5 = vmul.f32 0.35355338, %v573_v42 }
 0x242   :  { %v3601_v45 = vmul.f32 0.35355338, %v3525_v27 }
 0x243   :  { %v1384_v47 = vsel %vm1353_vm3, %v3535_v44, -inf  ;;  %v1369_v10 = vsel %vm1353_vm3, %v3549_v5, -inf }
 0x244   :  { %v725_v48 = vpop.f32.mrb[6].mxu1  ;;  %1385 = vmax.xlane.f32.xlu0 %v1384_v47  ;;  %v1105_v49 = vpop.f32.mrb[12].mxu0 }
 0x245   :  { %v3539_v50 = vmul.f32 0.35355338, %v1105_v49  ;;  %v3070_v51 = vpop.f32.mrb[7].mxu1  ;;  %v3095_v52 = vpop.f32.mrb[13].mxu0  ;;  %v3553_v9 = vmul.f32 0.35355338, %v725_v48 }
 0x247   :  { %v1390_v53 = vsel %vm1353_vm3, %v3539_v50, -inf  ;;  %v1375_v0 = vsel %vm1353_vm3, %v3553_v9, -inf }
 0x248   :  { %1391 = vmax.xlane.f32.xlu1 %v1390_v53  ;;  %v877_v54 = vpop.f32.mrb[8].mxu1 }
 0x249   :  { %v3080_v55 = vpop.f32.mrb[9].mxu1  ;;  %v3557_v11 = vmul.f32 0.35355338, %v877_v54 }
 0x24b   :  { %v1381_v14 = vsel %vm1353_vm3, %v3557_v11, -inf }
 0x24c   :  { %v1029_v56 = vpop.f32.mrb[10].mxu1 }
 0x24d   :  { %v3090_v57 = vpop.f32.mrb[11].mxu1  ;;  %v3563_v12 = vmul.f32 0.35355338, %v1029_v56 }
 0x24f   :  { %v1387_v15 = vsel %vm1353_vm3, %v3563_v12, -inf }
 0x250   :  { %v1257_v58 = vpop.f32.mrb[14].mxu0  ;;  %v1181_v59 = vpop.f32.mrb[12].mxu1 }
 0x251   :  { %v3543_v60 = vmul.f32 0.35355338, %v1257_v58  ;;  %v3105_v61 = vpop.f32.mrb[15].mxu0  ;;  %v3100_v62 = vpop.f32.mrb[13].mxu1  ;;  %v3605_v47 = vmul.f32 0.35355338, %v1181_v59 }
 0x253   :  { %v1396_v4 = vsel %vm1353_vm3, %v3543_v60, -inf  ;;  %v1393_v27 = vsel %vm1353_vm3, %v3605_v47, -inf }
 0x254   :  { %1397 = vmax.xlane.f32.xlu1 %v1396_v4 }
 0x257   :  { %v1333_v6 = vpop.f32.mrb[14].mxu1 }
 0x258   :  { %v3110_v8 = vpop.f32.mrb[15].mxu1  ;;  %1364 = vmax.xlane.f32.xlu1 %v1363_v7  ;;  %v3577_v22 = vmul.f32 0.35355338, %v1333_v6 }
 0x25a   :  { %v1399_v21 = vsel %vm1353_vm3, %v3577_v22, -inf }
 0x25c   :  { %1370 = vmax.xlane.f32.xlu1 %v1369_v10 }
 0x260   :  { %1376 = vmax.xlane.f32.xlu1 %v1375_v0 }
 0x264   :  { %1382 = vmax.xlane.f32.xlu1 %v1381_v14 }
 0x268   :  { %1388 = vmax.xlane.f32.xlu1 %v1387_v15 }
 0x26c   :  { %v1658_v17 = vpop.permute.xlu1 %1657 }
 0x26d   :  { %3117 = vmatpush3.msk.msra.mxu1 %vm1584_vm2, %v1658_v17 }
 0x26e   :  { %3126 = vmatprep.subr.mxu1 %v3274_v13 }
 0x270   :  { %v3585_v28 = vpop.permute.xlu0 %1965  ;;  %v3587_v2 = vpop.permute.xlu1 %1811 }
 0x274   :  { %v3589_v31 = vpop.permute.xlu0 %2119 }
 0x279   :  { %2504 = vrot.lane.b32.xlu1 %v3319_v3, %s3281_s22  ;;  %v3591_v3 = vpop.permute.xlu1 %2196 }
 0x27d   :  { %v3594_v36 = vpop.permute.xlu1 %2350 }
 0x29d   :  { %1400 = vmax.xlane.f32.xlu1 %v1399_v21 }
 0x2ae   :  { %v1356_v32 = vpop.xlane.xlu0 %1355 }
 0x2af   :  { %v1402_v34 = vsub.f32 %v3513_v24, %v1356_v32 }
 0x2b1   :  { %v1418_v35 = vmul.f32 1.442695, %v1402_v34 }
 0x2b3   :  { %3206 = vpow2.f32 %v1418_v35 }
 0x2b7   :  { %v1362_v38 = vpop.xlane.xlu1 %1361 }
 0x2b8   :  { %v1404_v39 = vsub.f32 %v3517_v26, %v1362_v38  ;;  %v1357_v26 = vsel %vm1353_vm3, %v3601_v45, -inf }
 0x2ba   :  { %v1422_v40 = vmul.f32 1.442695, %v1404_v39 }
 0x2bb   :  { %v1368_v41 = vpop.xlane.xlu1 %1367 }
 0x2bc   :  { %3208 = vpow2.f32 %v1422_v40  ;;  %v1406_v42 = vsub.f32 %v3521_v29, %v1368_v41 }
 0x2bd   :  { %v3598_v43 = vpop.eup %3206 }
 0x2be   :  { %v1426_v46 = vmul.f32 1.442695, %v1406_v42  ;;  %v1450_v24 = vsel %vm1353_vm3, %v3598_v43, 0.0 }
 0x2bf   :  { %1451 = vadd.xlane.f32.xlu0 %v1450_v24 }
 0x2c0   :  { %3210 = vpow2.f32 %v1426_v46 }
 0x2c3   :  { %1358 = vmax.xlane.f32.xlu0 %v1357_v26 }
 0x2c5   :  { %v1374_v48 = vpop.xlane.xlu0 %1373 }
 0x2c6   :  { %v3609_v49 = vpop.eup %3208  ;;  %v1408_v29 = vsub.f32 %v3527_v33, %v1374_v48 }
 0x2c7   :  { %1394 = vmax.xlane.f32.xlu0 %v1393_v27  ;;  %v1456_v51 = vsel %vm1353_vm3, %v3609_v49, 0.0 }
 0x2c8   :  { %v1430_v52 = vmul.f32 1.442695, %v1408_v29  ;;  %1457 = vadd.xlane.f32.xlu1 %v1456_v51 }
 0x2c9   :  { %v1380_v53 = vpop.xlane.xlu1 %1379 }
 0x2ca   :  { %v3616_v54 = vpop.eup %3210  ;;  %3212 = vpow2.f32 %v1430_v52  ;;  %v1410_v55 = vsub.f32 %v3531_v37, %v1380_v53 }
 0x2cb   :  { %v1462_v56 = vsel %vm1353_vm3, %v3616_v54, 0.0 }
 0x2cc   :  { %v1434_v57 = vmul.f32 1.442695, %v1410_v55  ;;  %1463 = vadd.xlane.f32.xlu1 %v1462_v56 }
 0x2ce   :  { %3214 = vpow2.f32 %v1434_v57 }
 0x2d1   :  { %v1386_v33 = vpop.xlane.xlu0 %1385 }
 0x2d2   :  { %v1412_v58 = vsub.f32 %v3535_v44, %v1386_v33 }
 0x2d4   :  { %v3622_v59 = vpop.eup %3212  ;;  %v1438_v61 = vmul.f32 1.442695, %v1412_v58 }
 0x2d5   :  { %v1392_v62 = vpop.xlane.xlu1 %1391  ;;  %v1468_v4 = vsel %vm1353_vm3, %v3622_v59, 0.0 }
 0x2d6   :  { %3216 = vpow2.f32 %v1438_v61  ;;  %v1414_v6 = vsub.f32 %v3539_v50, %v1392_v62  ;;  %1469 = vadd.xlane.f32.xlu1 %v1468_v4 }
 0x2d8   :  { %v3627_v37 = vpop.eup %3214  ;;  %v1442_v7 = vmul.f32 1.442695, %v1414_v6 }
 0x2d9   :  { %v1474_v8 = vsel %vm1353_vm3, %v3627_v37, 0.0 }
 0x2da   :  { %3218 = vpow2.f32 %v1442_v7  ;;  %1475 = vadd.xlane.f32.xlu1 %v1474_v8 }
 0x2dd   :  { %2273 = vrot.lane.b32.xlu0 %v109_v18, %s3281_s22 }
 0x2e0   :  { %v3632_v44 = vpop.eup %3216 }
 0x2e1   :  { %v1398_v10 = vpop.xlane.xlu1 %1397  ;;  %v1480_v0 = vsel %vm1353_vm3, %v3632_v44, 0.0 }
 0x2e2   :  { %v1416_v14 = vsub.f32 %v3543_v60, %v1398_v10  ;;  %1481 = vadd.xlane.f32.xlu1 %v1480_v0 }
 0x2e4   :  { %v3637_v50 = vpop.eup %3218  ;;  %v1446_v15 = vmul.f32 1.442695, %v1416_v14 }
 0x2e5   :  { %v1365_v17 = vpop.xlane.xlu1 %1364  ;;  %v1486_v21 = vsel %vm1353_vm3, %v3637_v50, 0.0 }
 0x2e6   :  { %3220 = vpow2.f32 %v1446_v15  ;;  %v1405_v32 = vsub.f32 %v3545_v63, %v1365_v17  ;;  %1487 = vadd.xlane.f32.xlu1 %v1486_v21 }
 0x2e8   :  { %v1424_v18 = vmul.f32 1.442695, %v1405_v32 }
 0x2e9   :  { %v1371_v34 = vpop.xlane.xlu1 %1370 }
 0x2ea   :  { %3222 = vpow2.f32 %v1424_v18  ;;  %v1407_v35 = vsub.f32 %v3549_v5, %v1371_v34 }
 0x2ec   :  { %v1428_v38 = vmul.f32 1.442695, %v1407_v35 }
 0x2ed   :  { %v1377_v5 = vpop.xlane.xlu1 %1376 }
 0x2ee   :  { %3224 = vpow2.f32 %v1428_v38 }
 0x2f0   :  { %v3643_v60 = vpop.eup %3220 }
 0x2f1   :  { %v1492_v39 = vsel %vm1353_vm3, %v3643_v60, 0.0  ;;  %v1383_v46 = vpop.xlane.xlu1 %1382 }
 0x2f2   :  { %1493 = vadd.xlane.f32.xlu1 %v1492_v39  ;;  %v1411_v24 = vsub.f32 %v3557_v11, %v1383_v46 }
 0x2f4   :  { %v3647_v40 = vpop.eup %3222  ;;  %v1436_v48 = vmul.f32 1.442695, %v1411_v24 }
 0x2f5   :  { %v1459_v41 = vsel %vm1353_vm3, %v3647_v40, 0.0  ;;  %v1389_v26 = vpop.xlane.xlu1 %1388 }
 0x2f6   :  { %1460 = vadd.xlane.f32.xlu1 %v1459_v41  ;;  %v1413_v29 = vsub.f32 %v3563_v12, %v1389_v26  ;;  %3226 = vpow2.f32 %v1436_v48  ;;  %v1409_v12 = vsub.f32 %v3553_v9, %v1377_v5 }
 0x2f8   :  { %v3651_v63 = vpop.eup %3224  ;;  %v1440_v27 = vmul.f32 1.442695, %v1413_v29  ;;  %v1432_v58 = vmul.f32 1.442695, %v1409_v12 }
 0x2f9   :  { %v1465_v42 = vsel %vm1353_vm3, %v3651_v63, 0.0  ;;  %v3667_v11 = vpop.permute.xlu1 %2504 }
 0x2fa   :  { %1466 = vadd.xlane.f32.xlu1 %v1465_v42  ;;  %3228 = vpow2.f32 %v1440_v27 }
 0x300   :  { %v3659_v51 = vpop.eup %3226 }
 0x301   :  { %v1477_v52 = vsel %vm1353_vm3, %v3659_v51, 0.0 }
 0x304   :  { %v3663_v53 = vpop.eup %3228 }
 0x30b   :  { %2658 = vrot.lane.b32.xlu1 %v3376_v30, %s3281_s22  ;;  %v1483_v30 = vsel %vm1353_vm3, %v3663_v53, 0.0 }
 0x32a   :  { %v3670_v57 = vpop.xlane.xlu1 %1400 }
 0x32f   :  { %1478 = vadd.xlane.f32.xlu1 %v1477_v52 }
 0x333   :  { %1484 = vadd.xlane.f32.xlu1 %v1483_v30 }
 0x34c   :  { %v1452_v55 = vpop.xlane.xlu0 %1451 }
 0x34d   :  { %3230 = vrcp.f32 %v1452_v55 }
 0x350   :  { %v1359_v56 = vpop.xlane.xlu0 %1358 }
 0x351   :  { %v1403_v33 = vsub.f32 %v3601_v45, %v1359_v56 }
 0x353   :  { %v1420_v61 = vmul.f32 1.442695, %v1403_v33 }
 0x354   :  { %v1395_v62 = vpop.xlane.xlu0 %1394 }
 0x355   :  { %3232 = vpow2.f32 %v1420_v61  ;;  %v1415_v4 = vsub.f32 %v3605_v47, %v1395_v62  ;;  %v1458_v6 = vpop.xlane.xlu1 %1457 }
 0x356   :  { %3234 = vrcp.f32 %v1458_v6 }
 0x357   :  { %v3231_v7 = vpop.eup %3230  ;;  %3236 = vpow2.f32 %v1432_v58  ;;  %v1444_v8 = vmul.f32 1.442695, %v1415_v4 }
 0x358   :  { %v1514_v10 = vmul.f32 %v3231_v7, %v1452_v55 }
 0x359   :  { %3238 = vpow2.f32 %v1444_v8  ;;  %v1464_v0 = vpop.xlane.xlu1 %1463 }
 0x35a   :  { %v1530_v9 = vsub.f32 2.0, %v1514_v10  ;;  %3240 = vrcp.f32 %v1464_v0 }
 0x35c   :  { %v1546_v14 = vmul.f32 %v3231_v7, %v1530_v9 }
 0x35e   :  { %v1562_v45 = vmul.f32 %v3598_v43, %v1546_v14 }
 0x35f   :  { %v3675_v15 = vpop.eup %3232 }
 0x360   :  { %v3235_v17 = vpop.eup %3234  ;;  %3114 = vmatmul.mubr.msk.f32.vlgmr.msra.gmra.mrb[16].mxu0 %vm1580_vm4, %v1562_v45  ;;  %v1453_v47 = vsel %vm1353_vm3, %v3675_v15, 0.0  ;;  %v2274_v45 = vpop.permute.xlu0 %2273 }
 0x361   :  { %v3680_v21 = vpop.eup %3236  ;;  %v1516_v32 = vmul.f32 %v3235_v17, %v1458_v6  ;;  %3122 = vmatpush3.msk.msra.mxu0 %vm1584_vm2, %v3583_v25  ;;  %1454 = vadd.xlane.f32.xlu0 %v1453_v47 }
 0x362   :  { %3123 = vmatprep.mubr.msk.f32.mxu0 %vm3275_vm1, %v3274_v13  ;;  %3131 = vmatprep.subr.mxu0 %v3274_v13  ;;  %v1471_v38 = vsel %vm1353_vm3, %v3680_v21, 0.0 }
 0x363   :  { %v3687_v43 = vpop.eup %3238  ;;  %v1532_v18 = vsub.f32 2.0, %v1516_v32  ;;  %v1470_v34 = vpop.xlane.xlu1 %1469 }
 0x364   :  { %v3241_v35 = vpop.eup %3240  ;;  %3242 = vrcp.f32 %v1470_v34  ;;  %v1489_v39 = vsel %vm1353_vm3, %v3687_v43, 0.0 }
 0x365   :  { %v1548_v41 = vmul.f32 %v3235_v17, %v1532_v18  ;;  %v1518_v25 = vmul.f32 %v3241_v35, %v1464_v0  ;;  %1472 = vadd.xlane.f32.xlu0 %v1471_v38  ;;  %1490 = vadd.xlane.f32.xlu1 %v1489_v39 }
 0x367   :  { %v1564_v42 = vmul.f32 %v3609_v49, %v1548_v41  ;;  %v1534_v5 = vsub.f32 2.0, %v1518_v25  ;;  %v1476_v46 = vpop.xlane.xlu1 %1475 }
 0x368   :  { %3244 = vrcp.f32 %v1476_v46 }
 0x369   :  { %v1550_v24 = vmul.f32 %v3241_v35, %v1534_v5  ;;  %3124 = vmatmul.mubr.msk.f32.vlgmr.msra.gmra.mrb[18].mxu0 %vm1580_vm4, %v1564_v42 }
 0x36a   :  { %3132 = vmatpush3.msk.msra.mxu0 %vm1584_vm2, %v3561_v1  ;;  %3133 = vmatprep.mubr.msk.f32.mxu0 %vm3275_vm1, %v3274_v13 }
 0x36b   :  { %v1566_v26 = vmul.f32 %v3616_v54, %v1550_v24  ;;  %3141 = vmatprep.subr.mxu0 %v3274_v13 }
 0x36d   :  { %3134 = vmatmul.mubr.msk.f32.vlgmr.msra.gmra.mrb[20].mxu0 %vm1580_vm4, %v1566_v26 }
 0x36e   :  { %v3243_v48 = vpop.eup %3242  ;;  %3142 = vmatpush3.msk.msra.mxu0 %vm1584_vm2, %v3569_v16  ;;  %3143 = vmatprep.mubr.msk.f32.mxu0 %vm3275_vm1, %v3274_v13 }
 0x36f   :  { %v1520_v49 = vmul.f32 %v3243_v48, %v1470_v34  ;;  %v1482_v29 = vpop.xlane.xlu1 %1481  ;;  %3151 = vmatprep.subr.mxu0 %v3274_v13 }
 0x370   :  { %3246 = vrcp.f32 %v1482_v29 }
 0x371   :  { %v1536_v1 = vsub.f32 2.0, %v1520_v49 }
 0x372   :  { %v3245_v27 = vpop.eup %3244 }
 0x373   :  { %v1552_v52 = vmul.f32 %v3243_v48, %v1536_v1  ;;  %v1522_v54 = vmul.f32 %v3245_v27, %v1476_v46  ;;  %v1488_v30 = vpop.xlane.xlu1 %1487 }
 0x374   :  { %3248 = vrcp.f32 %v1488_v30 }
 0x375   :  { %v1568_v55 = vmul.f32 %v3622_v59, %v1552_v52  ;;  %v1538_v12 = vsub.f32 2.0, %v1522_v54 }
 0x376   :  { %2735 = vrot.lane.b32.xlu1 %v3579_v23, %s3281_s22 }
 0x377   :  { %v1554_v16 = vmul.f32 %v3245_v27, %v1538_v12  ;;  %3144 = vmatmul.mubr.msk.f32.vlgmr.msra.gmra.mrb[22].mxu0 %vm1580_vm4, %v1568_v55 }
 0x378   :  { %3152 = vmatpush3.msk.msra.mxu0 %vm1584_vm2, %v3591_v3  ;;  %3153 = vmatprep.mubr.msk.f32.mxu0 %vm3275_vm1, %v3274_v13 }
 0x379   :  { %v1570_v56 = vmul.f32 %v3627_v37, %v1554_v16  ;;  %3161 = vmatprep.subr.mxu0 %v3274_v13 }
 0x37a   :  { %v3247_v33 = vpop.eup %3246 }
 0x37b   :  { %v1524_v58 = vmul.f32 %v3247_v33, %v1482_v29  ;;  %2427 = vrot.lane.b32.xlu0 %v3575_v20, %s3281_s22  ;;  %3154 = vmatmul.mubr.msk.f32.vlgmr.msra.gmra.mrb[24].mxu0 %vm1580_vm4, %v1570_v56 }
 0x37c   :  { %3162 = vmatpush3.msk.msra.mxu0 %vm1584_vm2, %v3594_v36  ;;  %3163 = vmatprep.mubr.msk.f32.mxu0 %vm3275_vm1, %v3274_v13  ;;  %v1417_v36 = vsub.f32 %v3577_v22, %v3670_v57 }
 0x37d   :  { %v1540_v23 = vsub.f32 2.0, %v1524_v58  ;;  %3171 = vmatprep.subr.mxu0 %v3274_v13 }
 0x37e   :  { %v3249_v3 = vpop.eup %3248  ;;  %v1448_v8 = vmul.f32 1.442695, %v1417_v36 }
 0x37f   :  { %v1556_v59 = vmul.f32 %v3247_v33, %v1540_v23  ;;  %v1526_v37 = vmul.f32 %v3249_v3, %v1488_v30  ;;  %v1494_v61 = vpop.xlane.xlu1 %1493 }
 0x380   :  { %3250 = vrcp.f32 %v1494_v61 }
 0x381   :  { %v1572_v62 = vmul.f32 %v3632_v44, %v1556_v59  ;;  %v1542_v4 = vsub.f32 2.0, %v1526_v37  ;;  %3252 = vpow2.f32 %v1448_v8 }
 0x383   :  { %v1558_v20 = vmul.f32 %v3249_v3, %v1542_v4  ;;  %3164 = vmatmul.mubr.msk.f32.vlgmr.msra.gmra.mrb[26].mxu0 %vm1580_vm4, %v1572_v62  ;;  %v1461_v6 = vpop.xlane.xlu1 %1460 }
 0x384   :  { %3172 = vmatpush3.msk.msra.mxu0 %vm1584_vm2, %v3667_v11  ;;  %3173 = vmatprep.mubr.msk.f32.mxu0 %vm3275_vm1, %v3274_v13  ;;  %3254 = vrcp.f32 %v1461_v6 }
 0x385   :  { %v1574_v7 = vmul.f32 %v3637_v50, %v1558_v20  ;;  %3181 = vmatprep.subr.mxu0 %v3274_v13 }
 0x387   :  { %3174 = vmatmul.mubr.msk.f32.vlgmr.msra.gmra.mrb[28].mxu0 %vm1580_vm4, %v1574_v7  ;;  %v1467_v44 = vpop.xlane.xlu1 %1466 }
 0x388   :  { %3183 = vmatprep.mubr.msk.f32.mxu0 %vm3275_vm1, %v3274_v13  ;;  %3256 = vrcp.f32 %v1467_v44 }
 0x38a   :  { %v3251_v10 = vpop.eup %3250 }
 0x38b   :  { %v1528_v0 = vmul.f32 %v3251_v10, %v1494_v61  ;;  %v2659_v22 = vpop.permute.xlu1 %2658  ;;  %v3741_v50 = vpop.eup %3252 }
 0x38c   :  { %3182 = vmatpush3.msk.msra.mxu0 %vm1584_vm2, %v2659_v22  ;;  %v1495_v14 = vsel %vm1353_vm3, %v3741_v50, 0.0 }
 0x38d   :  { %v1544_v11 = vsub.f32 2.0, %v1528_v0 }
 0x38f   :  { %v1560_v57 = vmul.f32 %v3251_v10, %v1544_v11 }
 0x391   :  { %v1576_v9 = vmul.f32 %v3643_v60, %v1560_v57  ;;  %v3255_v60 = vpop.eup %3254 }
 0x392   :  { %v3257_v18 = vpop.eup %3256  ;;  %v1517_v34 = vmul.f32 %v3255_v60, %v1461_v6 }
 0x393   :  { %3184 = vmatmul.mubr.msk.f32.vlgmr.msra.gmra.mrb[30].mxu0 %vm1580_vm4, %v1576_v9  ;;  %v1519_v25 = vmul.f32 %v3257_v18, %v1467_v44 }
 0x394   :  { %v1533_v41 = vsub.f32 2.0, %v1517_v34 }
 0x395   :  { %v1535_v24 = vsub.f32 2.0, %v1519_v25 }
 0x396   :  { %v1549_v46 = vmul.f32 %v3255_v60, %v1533_v41 }
 0x397   :  { %v1551_v1 = vmul.f32 %v3257_v18, %v1535_v24 }
 0x398   :  { %v1565_v29 = vmul.f32 %v3647_v40, %v1549_v46 }
 0x39a   :  { %1496 = vadd.xlane.f32.xlu0 %v1495_v14 }
 0x3b0   :  { %2581 = vrot.lane.b32.xlu0 %v3501_v19, %s3281_s22 }
 0x3bc   :  { %v1479_v47 = vpop.xlane.xlu1 %1478 }
 0x3c0   :  { %v1485_v35 = vpop.xlane.xlu1 %1484 }
 0x3ee   :  { %v1455_v17 = vpop.xlane.xlu0 %1454 }
 0x3ef   :  { %3258 = vrcp.f32 %v1455_v17 }
 0x3f2   :  { %v1473_v32 = vpop.xlane.xlu0 %1472 }
 0x3f3   :  { %3260 = vrcp.f32 %v1473_v32 }
 0x3f4   :  { %3262 = vrcp.f32 %v1479_v47 }
 0x3f5   :  { %3264 = vrcp.f32 %v1485_v35 }
 0x3f6   :  { %v2428_v56 = vpop.permute.xlu0 %2427 }
 0x3f9   :  { %v3259_v38 = vpop.eup %3258 }
 0x3fa   :  { %v1515_v39 = vmul.f32 %v3259_v38, %v1455_v17 }
 0x3fc   :  { %v1531_v42 = vsub.f32 2.0, %v1515_v39 }
 0x3fd   :  { %v3261_v19 = vpop.eup %3260 }
 0x3fe   :  { %v1547_v5 = vmul.f32 %v3259_v38, %v1531_v42  ;;  %v1521_v48 = vmul.f32 %v3261_v19, %v1473_v32  ;;  %v3263_v49 = vpop.eup %3262 }
 0x3ff   :  { %v1523_v27 = vmul.f32 %v3263_v49, %v1479_v47  ;;  %v3265_v54 = vpop.eup %3264 }
 0x400   :  { %v1563_v26 = vmul.f32 %v3675_v15, %v1547_v5  ;;  %v1537_v52 = vsub.f32 2.0, %v1521_v48  ;;  %v1525_v30 = vmul.f32 %v3265_v54, %v1485_v35 }
 0x401   :  { %v1539_v15 = vsub.f32 2.0, %v1523_v27 }
 0x402   :  { %3119 = vmatmul.mubr.msk.f32.vlgmr.msra.gmra.mrb[16].mxu1 %vm1580_vm4, %v1563_v26  ;;  %v1553_v55 = vmul.f32 %v3261_v19, %v1537_v52 }
 0x403   :  { %3127 = vmatpush3.msk.msra.mxu1 %vm1584_vm2, %v3587_v2  ;;  %3128 = vmatprep.mubr.msk.f32.mxu1 %vm3275_vm1, %v3274_v13  ;;  %v1567_v2 = vmul.f32 %v3651_v63, %v1551_v1  ;;  %v1555_v40 = vmul.f32 %v3263_v49, %v1539_v15  ;;  %v1491_v63 = vpop.xlane.xlu1 %1490 }
 0x404   :  { %3136 = vmatprep.subr.mxu1 %v3274_v13  ;;  %v1569_v12 = vmul.f32 %v3680_v21, %v1553_v55  ;;  %3266 = vrcp.f32 %v1491_v63 }
 0x405   :  { %v1571_v16 = vmul.f32 %v3659_v51, %v1555_v40 }
 0x406   :  { %3129 = vmatmul.mubr.msk.f32.vlgmr.msra.gmra.mrb[18].mxu1 %vm1580_vm4, %v1565_v29 }
 0x407   :  { %3137 = vmatpush3.msk.msra.mxu1 %vm1584_vm2, %v3585_v28  ;;  %3138 = vmatprep.mubr.msk.f32.mxu1 %vm3275_vm1, %v3274_v13  ;;  %v1541_v28 = vsub.f32 2.0, %v1525_v30  ;;  %v2736_v61 = vpop.permute.xlu1 %2735 }
 0x408   :  { %3146 = vmatprep.subr.mxu1 %v3274_v13 }
 0x40a   :  { %3139 = vmatmul.mubr.msk.f32.vlgmr.msra.gmra.mrb[20].mxu1 %vm1580_vm4, %v1567_v2 }
 0x40b   :  { %3147 = vmatpush3.msk.msra.mxu1 %vm1584_vm2, %v3589_v31  ;;  %3148 = vmatprep.mubr.msk.f32.mxu1 %vm3275_vm1, %v3274_v13  ;;  %v1557_v31 = vmul.f32 %v3265_v54, %v1541_v28 }
 0x40c   :  { %3156 = vmatprep.subr.mxu1 %v3274_v13 }
 0x40d   :  { %v1573_v21 = vmul.f32 %v3663_v53, %v1557_v31 }
 0x40e   :  { %3149 = vmatmul.mubr.msk.f32.vlgmr.msra.gmra.mrb[22].mxu1 %vm1580_vm4, %v1569_v12  ;;  %v3267_v51 = vpop.eup %3266 }
 0x40f   :  { %3157 = vmatpush3.msk.msra.mxu1 %vm1584_vm2, %v2274_v45  ;;  %3158 = vmatprep.mubr.msk.f32.mxu1 %vm3275_vm1, %v3274_v13  ;;  %v1527_v33 = vmul.f32 %v3267_v51, %v1491_v63 }
 0x410   :  { %3166 = vmatprep.subr.mxu1 %v3274_v13 }
 0x411   :  { %v1543_v58 = vsub.f32 2.0, %v1527_v33 }
 0x412   :  { %3159 = vmatmul.mubr.msk.f32.vlgmr.msra.gmra.mrb[24].mxu1 %vm1580_vm4, %v1571_v16 }
 0x413   :  { %3167 = vmatpush3.msk.msra.mxu1 %vm1584_vm2, %v2428_v56  ;;  %3168 = vmatprep.mubr.msk.f32.mxu1 %vm3275_vm1, %v3274_v13  ;;  %v1559_v23 = vmul.f32 %v3267_v51, %v1543_v58 }
 0x414   :  { %3176 = vmatprep.subr.mxu1 %v3274_v13 }
 0x415   :  { %v1575_v59 = vmul.f32 %v3687_v43, %v1559_v23 }
 0x416   :  { %3169 = vmatmul.mubr.msk.f32.vlgmr.msra.gmra.mrb[26].mxu1 %vm1580_vm4, %v1573_v21 }
 0x417   :  { %3178 = vmatprep.mubr.msk.f32.mxu1 %vm3275_vm1, %v3274_v13 }
 0x427   :  { %v1497_v3 = vpop.xlane.xlu0 %1496 }
 0x428   :  { %3268 = vrcp.f32 %v1497_v3 }
 0x42b   :  { %v2582_v37 = vpop.permute.xlu0 %2581 }
 0x42c   :  { %3177 = vmatpush3.msk.msra.mxu1 %vm1584_vm2, %v2582_v37 }
 0x42d   :  { %3179 = vmatmul.mubr.msk.f32.vlgmr.msra.gmra.mrb[28].mxu1 %vm1580_vm4, %v1575_v59  ;;  %3186 = vmatprep.subr.mxu1 %v3274_v13 }
 0x42e   :  { %3187 = vmatpush3.msk.msra.mxu1 %vm1584_vm2, %v2736_v61  ;;  %3188 = vmatprep.mubr.msk.f32.mxu1 %vm3275_vm1, %v3274_v13 }
 0x432   :  { %v3269_v53 = vpop.eup %3268 }
 0x433   :  { %v1529_v62 = vmul.f32 %v3269_v53, %v1497_v3  ;;  %v1653_v4 = vpop.f32.mrb[16].mxu0 }
 0x434   :  { %v3115_v20 = vpop.f32.mrb[17].mxu0  ;;  %v2860_v49 = vsel %vm122_vm0, %v1653_v4, 0.0 }
 0x435   :  { %v1545_v6 = vsub.f32 2.0, %v1529_v62 }
 0x437   :  { %v1561_v36 = vmul.f32 %v3269_v53, %v1545_v6 }
 0x439   :  { %v1577_v43 = vmul.f32 %v3741_v50, %v1561_v36 }
 0x43b   :  { %3189 = vmatmul.mubr.msk.f32.vlgmr.msra.gmra.mrb[30].mxu1 %vm1580_vm4, %v1577_v43 }
 0x43c   :  { %v1807_v7 = vpop.f32.mrb[18].mxu0 }
 0x43d   :  { %2816 = vrot.lane.b32.xlu0 %v1807_v7, %s3282_s23  ;;  %v3125_v44 = vpop.f32.mrb[19].mxu0 }
 0x440   :  { %v1961_v8 = vpop.f32.mrb[20].mxu0 }
 0x441   :  { %v3135_v10 = vpop.f32.mrb[21].mxu0  ;;  %v2861_v15 = vsel %vm122_vm0, %v1961_v8, 0.0 }
 0x44a   :  { %v2115_v0 = vpop.f32.mrb[22].mxu0 }
 0x44b   :  { %2818 = vrot.lane.b32.xlu1 %v2115_v0, %s3282_s23  ;;  %v3145_v22 = vpop.f32.mrb[23].mxu0 }
 0x44e   :  { %v3793_v13 = vpop.f32.mrb[24].mxu0 }
 0x44f   :  { %v3155_v11 = vpop.f32.mrb[25].mxu0  ;;  %v2862_v21 = vsel %vm122_vm0, %v3793_v13, 0.0 }
 0x456   :  { %v2423_v57 = vpop.f32.mrb[26].mxu0 }
 0x457   :  { %2820 = vrot.lane.b32.xlu0 %v2423_v57, %s3282_s23  ;;  %v3165_v9 = vpop.f32.mrb[27].mxu0 }
 0x45a   :  { %v3795_v14 = vpop.f32.mrb[28].mxu0 }
 0x45b   :  { %v3175_v50 = vpop.f32.mrb[29].mxu0  ;;  %v2863_v6 = vsel %vm122_vm0, %v3795_v14, 0.0 }
 0x466   :  { %v2731_v45 = vpop.f32.mrb[30].mxu0 }
 0x467   :  { %2822 = vrot.lane.b32.xlu1 %v2731_v45, %s3282_s23  ;;  %v3185_v17 = vpop.f32.mrb[31].mxu0 }
 0x4af   :  { %v2817_v48 = vpop.permute.xlu0 %2816 }
 0x4b0   :  { %v2865_v29 = vsel %vm2864_vm5, %v2860_v49, %v2817_v48 }
 0x4b1   :  { %v2870_v27 = vsel %vm2869_vm6, %v2865_v29, 0.0 }
 0x4b2   :  { %v2875_v54 = vsel %vm2874_vm7, %v2870_v27, 0.0 }
 0x4bd   :  { %v2819_v52 = vpop.permute.xlu1 %2818 }
 0x4be   :  { %v2866_v55 = vsel %vm2864_vm5, %v2861_v15, %v2819_v52 }
 0x4bf   :  { %v2871_v63 = vsel %vm2869_vm6, %v2866_v55, 0.0 }
 0x4c0   :  { %v2876_v31 = vsel %vm2874_vm7, %v2871_v63, 0.0 }
 0x4c9   :  { %v2821_v1 = vpop.permute.xlu0 %2820 }
 0x4ca   :  { %v2867_v33 = vsel %vm2864_vm5, %v2862_v21, %v2821_v1 }
 0x4cb   :  { %v2872_v3 = vsel %vm2869_vm6, %v2867_v33, 0.0 }
 0x4cc   :  { %v2877_v37 = vsel %vm2874_vm7, %v2872_v3, 0.0 }
 0x4d5   :  { %v1730_v47 = vpop.f32.mrb[16].mxu1 }
 0x4d6   :  { %v3120_v32 = vpop.f32.mrb[17].mxu1  ;;  %2832 = vrot.lane.b32.xlu0 %v1730_v47, %s3283_s24 }
 0x4d9   :  { %v1884_v60 = vpop.f32.mrb[18].mxu1  ;;  %v2823_v40 = vpop.permute.xlu1 %2822 }
 0x4da   :  { %v3130_v18 = vpop.f32.mrb[19].mxu1  ;;  %2848 = vrot.lane.b32.xlu0 %v1884_v60, %s3284_s25  ;;  %v2868_v36 = vsel %vm2864_vm5, %v2863_v6, %v2823_v40 }
 0x4db   :  { %v2873_v43 = vsel %vm2869_vm6, %v2868_v36, 0.0 }
 0x4dc   :  { %v2878_v44 = vsel %vm2874_vm7, %v2873_v43, 0.0 }
 0x4dd   :  { %v2038_v34 = vpop.f32.mrb[20].mxu1 }
 0x4de   :  { %v3140_v35 = vpop.f32.mrb[21].mxu1  ;;  %2834 = vrot.lane.b32.xlu1 %v2038_v34, %s3283_s24 }
 0x4e1   :  { %v2192_v38 = vpop.f32.mrb[22].mxu1 }
 0x4e2   :  { %v3150_v39 = vpop.f32.mrb[23].mxu1  ;;  %2850 = vrot.lane.b32.xlu1 %v2192_v38, %s3284_s25 }
 0x4e5   :  { %v2346_v41 = vpop.f32.mrb[24].mxu1 }
 0x4e6   :  { %v3160_v25 = vpop.f32.mrb[25].mxu1  ;;  %2836 = vrot.lane.b32.xlu0 %v2346_v41, %s3283_s24 }
 0x4e9   :  { %v2500_v42 = vpop.f32.mrb[26].mxu1 }
 0x4ea   :  { %v3170_v19 = vpop.f32.mrb[27].mxu1  ;;  %2852 = vrot.lane.b32.xlu0 %v2500_v42, %s3284_s25 }
 0x500   :  { %v2654_v5 = vpop.f32.mrb[28].mxu1 }
 0x501   :  { %v3180_v46 = vpop.f32.mrb[29].mxu1  ;;  %2838 = vrot.lane.b32.xlu1 %v2654_v5, %s3283_s24 }
 0x50e   :  { %v2808_v24 = vpop.f32.mrb[30].mxu1 }
 0x50f   :  { %v3190_v26 = vpop.f32.mrb[31].mxu1  ;;  %2854 = vrot.lane.b32.xlu1 %v2808_v24, %s3284_s25 }
 0x548   :  { %v2833_v2 = vpop.permute.xlu0 %2832 }
 0x549   :  { %v2880_v30 = vsel %vm2879_vm8, %v2875_v54, %v2833_v2 }
 0x54a   :  { %v2885_v28 = vsel %vm2884_vm9, %v2880_v30, 0.0 }
 0x54c   :  { %v2849_v12 = vpop.permute.xlu0 %2848 }
 0x54d   :  { %v2890_v16 = vsel %vm2889_vm10, %v2885_v28, %v2849_v12 }
 0x54e   :  { %2895 = vst.msk [vmem:[%s3844_s1] sm:$0xf] %vm2894_vm11, %v2890_v16 }
 0x550   :  { %v2835_v56 = vpop.permute.xlu1 %2834 }
 0x551   :  { %v2881_v51 = vsel %vm2879_vm8, %v2876_v31, %v2835_v56 }
 0x552   :  { %v2886_v58 = vsel %vm2884_vm9, %v2881_v51, 0.0 }
 0x554   :  { %v2851_v23 = vpop.permute.xlu1 %2850 }
 0x555   :  { %v2891_v59 = vsel %vm2889_vm10, %v2886_v58, %v2851_v23 }
 0x556   :  { %2896 = vst.msk [vmem:[%s3844_s1 + $0x4] sm:$0xf] %vm2894_vm11, %v2891_v59 }
 0x558   :  { %v2837_v61 = vpop.permute.xlu0 %2836 }
 0x559   :  { %v2882_v53 = vsel %vm2879_vm8, %v2877_v37, %v2837_v61 }
 0x55a   :  { %v2887_v62 = vsel %vm2884_vm9, %v2882_v53, 0.0 }
 0x55c   :  { %v2853_v4 = vpop.permute.xlu0 %2852 }
 0x55d   :  { %v2892_v20 = vsel %vm2889_vm10, %v2887_v62, %v2853_v4 }
 0x55e   :  { %2897 = vst.msk [vmem:[%s3844_s1 + $0x8] sm:$0xf] %vm2894_vm11, %v2892_v20 }
 0x573   :  { %v2839_v7 = vpop.permute.xlu1 %2838 }
 0x574   :  { %v2883_v8 = vsel %vm2879_vm8, %v2878_v44, %v2839_v7 }
 0x575   :  { %v2888_v10 = vsel %vm2884_vm9, %v2883_v8, 0.0 }
 0x581   :  { %v2855_v0 = vpop.permute.xlu1 %2854 }
 0x582   :  { %v2893_v22 = vsel %vm2889_vm10, %v2888_v10, %v2855_v0 }
 0x583   :  { %2898 = vst.msk [vmem:[%s3844_s1 + $0xc] sm:$0xf] %vm2894_vm11, %v2893_v22 }

</bundles_post_ra>
